<compile_context>
chip_gen: v7x
topology: tpu7x:2x2x1
jax: 0.10.0
libtpu: 0.0.40
codegen_flags: <defaults>
</compile_context>

<pallas_src>
import jax
import jax.numpy as jnp
from jax.experimental import pallas as pl
from jax.experimental.pallas import tpu as pltpu


def _leaky_relu(x, slope=0.2):
    return jnp.where(x > 0, x, slope * x)


def _round_up(x, m):
    return ((x + m - 1) // m) * m


def discriminator_kernel(x_ref, w1_ref, b1_ref, w2_ref, b2_ref, w3_ref, b3_ref,
                         o_ref):
    # Layer 1: cast the streamed f32 tile to bf16 in-kernel (VPU), then
    # (tn, 784) bf16 @ (784, 512) bf16 -> f32 acc.  Mosaic masks the ragged K=784.
    x = x_ref[...].astype(jnp.bfloat16)
    h = jnp.dot(x, w1_ref[...], preferred_element_type=jnp.float32)
    h = _leaky_relu(h + b1_ref[...])
    # Layer 2: (tn, 512) bf16 @ (512, 256) bf16 -> f32 acc.
    h = jnp.dot(h.astype(jnp.bfloat16), w2_ref[...],
                preferred_element_type=jnp.float32)
    h = _leaky_relu(h + b2_ref[...])                       # (tn, 256) f32
    # Layer 3, transposed for a lane-dense output: (1,256) @ (256,tn) -> (1,tn).
    # The h transpose goes through the otherwise idle XLU; M=1 keeps MXU cost tiny.
    z = jnp.dot(w3_ref[...], h.T, preferred_element_type=jnp.float32)
    z = z + b3_ref[...]                                    # (1, tn)
    # Sigmoid: EUP exp + exact reciprocal (stays within [0, 1]).
    o_ref[...] = 1.0 / (1.0 + jnp.exp(-z))


def discriminator_forward(x_nchw, params, tile_n=1024):
    """x_nchw: (N, C, H, W) float32. Returns (N, 1) float32 in [0, 1]."""
    n = x_nchw.shape[0]
    x = x_nchw.reshape(n, -1).astype(jnp.float32)  # torch.flatten(input, 1)
    d = x.shape[1]                                  # 784 (unpadded; kernel handles it)
    w1, b1, w2, b2, w3, b3 = params
    h1 = w1.shape[1]  # 512
    h2 = w2.shape[1]  # 256

    # --- Batch tile: multiple of 128 (lane-dense output block).  On v7x, cap the
    # tile at ~half the batch so the 'parallel' grid has >= 2 steps for both TCs. ---
    tn_cap = _round_up(tile_n, 128)
    tn_half = max(128, _round_up(pl.cdiv(n, 2), 128))
    tn = min(tn_cap, tn_half)
    n_pad = _round_up(n, tn)
    if n_pad != n:
        # Zero-padded rows run through the net and are sliced off afterwards.
        x = jnp.pad(x, ((0, n_pad - n), (0, 0)))

    # --- Resident weights in bf16 (one-time tiny cast); biases stay f32. ---
    w1_bf = w1.astype(jnp.bfloat16)
    w2_bf = w2.astype(jnp.bfloat16)
    w3_row = w3.reshape(1, h2).astype(jnp.float32)   # (1, 256) for the transposed dot
    b1_2d = b1.reshape(1, h1).astype(jnp.float32)
    b2_2d = b2.reshape(1, h2).astype(jnp.float32)
    b3_2d = b3.reshape(1, 1).astype(jnp.float32)

    grid = (n_pad // tn,)
    out = pl.pallas_call(
        discriminator_kernel,
        out_shape=jax.ShapeDtypeStruct((1, n_pad), jnp.float32),
        grid=grid,
        in_specs=[
            pl.BlockSpec((tn, d), lambda i: (i, 0)),      # x tile (streamed, f32)
            pl.BlockSpec((d, h1), lambda i: (0, 0)),      # w1 (resident, bf16)
            pl.BlockSpec((1, h1), lambda i: (0, 0)),      # b1
            pl.BlockSpec((h1, h2), lambda i: (0, 0)),     # w2 (resident, bf16)
            pl.BlockSpec((1, h2), lambda i: (0, 0)),      # b2
            pl.BlockSpec((1, h2), lambda i: (0, 0)),      # w3 as a row
            pl.BlockSpec((1, 1), lambda i: (0, 0)),       # b3
        ],
        out_specs=pl.BlockSpec((1, tn), lambda i: (0, i)),  # lane-dense output slab
        compiler_params=pltpu.CompilerParams(
            dimension_semantics=("parallel",),
            vmem_limit_bytes=32 * 1024 * 1024,
        ),
    )(x, w1_bf, b1_2d, w2_bf, b2_2d, w3_row, b3_2d)
    # (1, n_pad) lane-major slab -> (N, 1)
    return out.reshape(-1)[:n].reshape(n, 1)


def init_params(key, image_size=28, channels=1):
    d = channels * image_size * image_size
    dims = [(d, 512), (512, 256), (256, 1)]
    params = []
    for fan_in, fan_out in dims:
        kw, kb, key = jax.random.split(key, 3)
        bound = 1.0 / jnp.sqrt(fan_in)
        w = jax.random.uniform(kw, (fan_in, fan_out), jnp.float32, -bound, bound)
        b = jax.random.uniform(kb, (1, fan_out), jnp.float32, -bound, bound)
        params += [w, b]
    return params


def reference_forward(x_nchw, params):
    w1, b1, w2, b2, w3, b3 = params
    x = x_nchw.reshape(x_nchw.shape[0], -1)
    h = _leaky_relu(x @ w1 + b1)
    h = _leaky_relu(h @ w2 + b2)
    return jax.nn.sigmoid(h @ w3 + b3)


if __name__ == "__main__":
    key = jax.random.PRNGKey(0)
    kx, kp = jax.random.split(key)

    image_size, channels, batch = 28, 1, 8
    x = jax.random.normal(kx, (batch, channels, image_size, image_size),
                          jnp.float32)
    params = init_params(kp, image_size=image_size, channels=channels)

    out = discriminator_forward(x, params)
    out = jax.block_until_ready(out)

    ref = reference_forward(x, params)
    assert out.shape == (batch, 1), out.shape
    # Tolerance accounts for bf16 MXU operands (f32 accumulation) and the bf16
    # cast of the layer-1 activations before layer 2.
    assert jnp.allclose(out, ref, atol=3e-2, rtol=3e-2), (
        f"max abs err {jnp.max(jnp.abs(out - ref))}")

    print("KERNEL_OK")
</pallas_src>

<mosaic_0001>
module attributes {stable_mosaic.version = 11 : i64} {
  func.func @discriminator_kernel(%arg0: i32, %arg1: memref<128x784xf32, #tpu.memory_space<vmem>>, %arg2: memref<784x512xbf16, #tpu.memory_space<vmem>>, %arg3: memref<1x512xf32, #tpu.memory_space<vmem>>, %arg4: memref<512x256xbf16, #tpu.memory_space<vmem>>, %arg5: memref<1x256xf32, #tpu.memory_space<vmem>>, %arg6: memref<1x256xf32, #tpu.memory_space<vmem>>, %arg7: memref<1x1xf32, #tpu.memory_space<vmem>>, %arg8: memref<1x128xf32, #tpu.memory_space<vmem>>) attributes {dimension_semantics = [#tpu.dimension_semantics<parallel>], iteration_bounds = array<i64: 1>, scalar_prefetch = 0 : i64, scratch_operands = 0 : i64, tpu.core_type = #tpu.core_type<tc>, window_params = [{transform_indices = @transform_0, window_bounds = array<i64: 128, 784>}, {pipeline_mode = #tpu.pipeline_mode<synchronous>, transform_indices = @transform_1, window_bounds = array<i64: 784, 512>}, {pipeline_mode = #tpu.pipeline_mode<synchronous>, transform_indices = @transform_2, window_bounds = array<i64: 1, 512>}, {pipeline_mode = #tpu.pipeline_mode<synchronous>, transform_indices = @transform_3, window_bounds = array<i64: 512, 256>}, {pipeline_mode = #tpu.pipeline_mode<synchronous>, transform_indices = @transform_4, window_bounds = array<i64: 1, 256>}, {pipeline_mode = #tpu.pipeline_mode<synchronous>, transform_indices = @transform_5, window_bounds = array<i64: 1, 256>}, {pipeline_mode = #tpu.pipeline_mode<synchronous>, transform_indices = @transform_6, window_bounds = array<i64: 1, 1>}, {transform_indices = @transform_7, window_bounds = array<i64: 1, 128>}]} {
    %c0 = arith.constant 0 : index
    %c0_0 = arith.constant 0 : index
    %0 = vector.load %arg1[%c0, %c0_0] : memref<128x784xf32, #tpu.memory_space<vmem>>, vector<128x784xf32>
    %1 = arith.truncf %0 : vector<128x784xf32> to vector<128x784xbf16>
    %c0_1 = arith.constant 0 : index
    %c0_2 = arith.constant 0 : index
    %2 = vector.load %arg2[%c0_1, %c0_2] : memref<784x512xbf16, #tpu.memory_space<vmem>>, vector<784x512xbf16>
    %cst = arith.constant dense<0.000000e+00> : vector<128x512xf32>
    %3 = tpu.matmul %1, %2, %cst {dimension_numbers = #tpu.dot_dimension_numbers<[1], [0], [0], [1], [0, 0, 1, 1], [], []>} : vector<128x784xbf16>, vector<784x512xbf16>, vector<128x512xf32> -> vector<128x512xf32>
    %c0_3 = arith.constant 0 : index
    %c0_4 = arith.constant 0 : index
    %4 = vector.load %arg3[%c0_3, %c0_4] : memref<1x512xf32, #tpu.memory_space<vmem>>, vector<1x512xf32>
    %5 = vector.broadcast %4 : vector<1x512xf32> to vector<128x512xf32>
    %6 = arith.addf %3, %5 : vector<128x512xf32>
    %cst_5 = arith.constant 0.000000e+00 : f32
    %7 = vector.broadcast %cst_5 : f32 to vector<128x512xf32>
    %8 = arith.cmpf ogt, %6, %7 : vector<128x512xf32>
    %cst_6 = arith.constant 2.000000e-01 : f32
    %9 = vector.broadcast %cst_6 : f32 to vector<128x512xf32>
    %10 = arith.mulf %9, %6 : vector<128x512xf32>
    %11 = arith.select %8, %6, %10 : vector<128x512xi1>, vector<128x512xf32>
    %12 = arith.truncf %11 : vector<128x512xf32> to vector<128x512xbf16>
    %c0_7 = arith.constant 0 : index
    %c0_8 = arith.constant 0 : index
    %13 = vector.load %arg4[%c0_7, %c0_8] : memref<512x256xbf16, #tpu.memory_space<vmem>>, vector<512x256xbf16>
    %cst_9 = arith.constant dense<0.000000e+00> : vector<128x256xf32>
    %14 = tpu.matmul %12, %13, %cst_9 {dimension_numbers = #tpu.dot_dimension_numbers<[1], [0], [0], [1], [0, 0, 1, 1], [], []>} : vector<128x512xbf16>, vector<512x256xbf16>, vector<128x256xf32> -> vector<128x256xf32>
    %c0_10 = arith.constant 0 : index
    %c0_11 = arith.constant 0 : index
    %15 = vector.load %arg5[%c0_10, %c0_11] : memref<1x256xf32, #tpu.memory_space<vmem>>, vector<1x256xf32>
    %16 = vector.broadcast %15 : vector<1x256xf32> to vector<128x256xf32>
    %17 = arith.addf %14, %16 : vector<128x256xf32>
    %cst_12 = arith.constant 0.000000e+00 : f32
    %18 = vector.broadcast %cst_12 : f32 to vector<128x256xf32>
    %19 = arith.cmpf ogt, %17, %18 : vector<128x256xf32>
    %cst_13 = arith.constant 2.000000e-01 : f32
    %20 = vector.broadcast %cst_13 : f32 to vector<128x256xf32>
    %21 = arith.mulf %20, %17 : vector<128x256xf32>
    %22 = arith.select %19, %17, %21 : vector<128x256xi1>, vector<128x256xf32>
    %c0_14 = arith.constant 0 : index
    %c0_15 = arith.constant 0 : index
    %23 = vector.load %arg6[%c0_14, %c0_15] : memref<1x256xf32, #tpu.memory_space<vmem>>, vector<1x256xf32>
    %24 = tpu.transpose %22, [1, 0] : vector<128x256xf32> -> vector<256x128xf32>
    %cst_16 = arith.constant dense<0.000000e+00> : vector<1x128xf32>
    %25 = tpu.matmul %23, %24, %cst_16 {dimension_numbers = #tpu.dot_dimension_numbers<[1], [0], [0], [1], [0, 0, 1, 1], [], []>} : vector<1x256xf32>, vector<256x128xf32>, vector<1x128xf32> -> vector<1x128xf32>
    %c0_17 = arith.constant 0 : index
    %c0_18 = arith.constant 0 : index
    %26 = vector.load %arg7[%c0_17, %c0_18] : memref<1x1xf32, #tpu.memory_space<vmem>>, vector<1x1xf32>
    %27 = vector.broadcast %26 : vector<1x1xf32> to vector<1x128xf32>
    %28 = arith.addf %25, %27 : vector<1x128xf32>
    %cst_19 = arith.constant 0.000000e+00 : f32
    %29 = vector.broadcast %cst_19 : f32 to vector<1x128xf32>
    %30 = arith.subf %29, %28 : vector<1x128xf32>
    %31 = math.exp %30 : vector<1x128xf32>
    %cst_20 = arith.constant 1.000000e+00 : f32
    %32 = vector.broadcast %cst_20 : f32 to vector<1x128xf32>
    %33 = arith.addf %32, %31 : vector<1x128xf32>
    %cst_21 = arith.constant 1.000000e+00 : f32
    %34 = vector.broadcast %cst_21 : f32 to vector<1x128xf32>
    %35 = arith.divf %34, %33 : vector<1x128xf32>
    %c0_22 = arith.constant 0 : index
    %c0_23 = arith.constant 0 : index
    %36 = vector.load %arg8[%c0_22, %c0_23] : memref<1x128xf32, #tpu.memory_space<vmem>>, vector<1x128xf32>
    tpu.vector_store %arg8[%c0_22, %c0_23], %35 {strides = array<i32>} : memref<1x128xf32, #tpu.memory_space<vmem>>, vector<1x128xf32>,
    return
  }
  func.func @transform_0(%arg0: i32) -> (i32, i32) {
    %c0_i32 = arith.constant 0 : i32
    %c0_i32_0 = arith.constant 0 : i32
    return %arg0, %c0_i32 : i32, i32
  }
  func.func @transform_1(%arg0: i32) -> (i32, i32) {
    %c0_i32 = arith.constant 0 : i32
    %c0_i32_0 = arith.constant 0 : i32
    %c0_i32_1 = arith.constant 0 : i32
    return %c0_i32, %c0_i32_0 : i32, i32
  }
  func.func @transform_2(%arg0: i32) -> (i32, i32) {
    %c0_i32 = arith.constant 0 : i32
    %c0_i32_0 = arith.constant 0 : i32
    %c0_i32_1 = arith.constant 0 : i32
    return %c0_i32, %c0_i32_0 : i32, i32
  }
  func.func @transform_3(%arg0: i32) -> (i32, i32) {
    %c0_i32 = arith.constant 0 : i32
    %c0_i32_0 = arith.constant 0 : i32
    %c0_i32_1 = arith.constant 0 : i32
    return %c0_i32, %c0_i32_0 : i32, i32
  }
  func.func @transform_4(%arg0: i32) -> (i32, i32) {
    %c0_i32 = arith.constant 0 : i32
    %c0_i32_0 = arith.constant 0 : i32
    %c0_i32_1 = arith.constant 0 : i32
    return %c0_i32, %c0_i32_0 : i32, i32
  }
  func.func @transform_5(%arg0: i32) -> (i32, i32) {
    %c0_i32 = arith.constant 0 : i32
    %c0_i32_0 = arith.constant 0 : i32
    %c0_i32_1 = arith.constant 0 : i32
    return %c0_i32, %c0_i32_0 : i32, i32
  }
  func.func @transform_6(%arg0: i32) -> (i32, i32) {
    %c0_i32 = arith.constant 0 : i32
    %c0_i32_0 = arith.constant 0 : i32
    %c0_i32_1 = arith.constant 0 : i32
    return %c0_i32, %c0_i32_0 : i32, i32
  }
  func.func @transform_7(%arg0: i32) -> (i32, i32) {
    %c0_i32 = arith.constant 0 : i32
    %c0_i32_0 = arith.constant 0 : i32
    return %c0_i32, %arg0 : i32, i32
  }
}

</mosaic_0001>

<bundles_post_ra>
// kernel: tpu_custom_call.1
= control target key start
LH: loop header
LB: loop body
LE: loop exit
PB: predicated region body
PF: predicated region fallthrough
CT: control target
= control target key end

     0   :  { %s5784_s0 = inlined_call_operand.vmem [shape: f32[128,784], index: 0, kind: input, shape index: {}]   ;;  %s5785_s1 = inlined_call_operand.vmem [shape: bf16[784,512], index: 1, kind: input, shape index: {}]   ;;  %s5786_s2 = inlined_call_operand.vmem [shape: f32[1,512], index: 2, kind: input, shape index: {}]   ;;  %s5787_s3 = inlined_call_operand.hbm [shape: bf16[512,256], index: 3, kind: input, shape index: {}]   ;;  %s5788_s4 = inlined_call_operand.vmem [shape: f32[1,256], index: 4, kind: input, shape index: {}]   ;;  %s5789_s5 = inlined_call_operand.vmem [shape: f32[1,256], index: 5, kind: input, shape index: {}]   ;;  %s5790_s6 = inlined_call_operand.<no memory space> [shape: f32[1,1], index: 6, kind: input, shape index: {}]   ;;  %s5791_s7 = inlined_call_operand.hbm [shape: f32[1,128], index: 7, kind: output, shape index: {}]  }
   0x1   :  { %v12_v0 = vstv %s5790_s6 }
   0x2   :  { %13 = vst [vmem:[#allocation2] sm:$0x1] %v12_v0 }
   0x3   :  { %14 = vsyncpa [#allocation4], 0 }
   0x4   :  { %15 = vsyncpa [#allocation5], 0  ;;  %s4471_s26 = smov [#allocation3]   ;;  %s4423_s30 = scalar_lea.hbm %s5787_s3, 8192 }
   0x5   :  { %s27_s27 = sshll.u32 %s4471_s26, 4  ;;  %p4424_p0 = scmp.ne.s32.totalorder %s5787_s3, %s4423_s30  ;;  %s28_s27 = int_to_ptr.vmem [resolvable:$true] %s27_s27 }
   0x6   :  { %p4427_p1 = scmp.lt.u32.totalorder %s4423_s30, %s5787_s3 }
   0x8   :  { %p4429_p2 = pnand %p4427_p1, %p4424_p0 }
   0xa   :  { %4432 = shalt.err (!%p4429_p2)
}
   0xb   :  { %s4433_s6 = scalar_lea.vmem %s28_s27, 8192  ;;  %p4438_p4 = scmp.lt.s32.totalorder %s28_s27, %s28_s27 }
   0xc   :  { %p4434_p3 = scmp.ne.s32.totalorder %s28_s27, %s4433_s6  ;;  %p4439_p5 = scmp.lt.s32.totalorder %s4433_s6, %s4433_s6 }
   0xe   :  { %p4440_p6 = por %p4439_p5, %p4438_p4 }
  0x10   :  { %p4441_p7 = pnand %p4440_p6, %p4434_p3 }
  0x12   :  { %4444 = shalt.err (!%p4441_p7)
}
  0x13   :  { %s4472_s12 = smov 128   ;;  %s4473_s13 = smov 8  }
  0x14   :  { %33 = dma.hbm_to_vmem [thread:$0]  %s5787_s3, 8192, %s28_s27, [#allocation4], %s4472_s12, %s4472_s12, %s4473_s13  }
  0x15   :  { %4467 = dma.done.wait [#allocation4], 8192  }
  0x16   :  { %4468 = vsyncadd [#allocation4], 4294959104  ;;  %v4474_v1 = vmov 0   ;;  %v4029_v2 = vld [vmem:[%s5785_s1 + $0x4] ss:$16 sps:$4 sm:$0xff]   ;;  %v57_v8 = vld [vmem:[%s5784_s0 + $0x68] sm:$0xff] }
  0x17   :  { %1806 = vmatprep.mubr.bf16.mxu1 %v4474_v1  ;;  %4028 = vset.pattern.permute.xlu0 %v4474_v1  ;;  %v4031_v3 = vld [vmem:[%s5785_s1 + $0x604] ss:$16 sps:$4 sm:$0xff]   ;;  %v4033_v4 = vld [vmem:[%s5785_s1] ss:$16 sps:$4 sm:$0xff]   ;;  %vm1410_vm0 = vcmask 130048   ;;  %v71_v19 = vld [vmem:[%s5784_s0 + $0xd8] sm:$0xff] }
  0x18   :  { %1435 = vmatprep.subr.bf16.mxu0 %v4029_v2  ;;  %v4034_v5 = vld [vmem:[%s5785_s1 + $0x600] ss:$16 sps:$4 sm:$0xff]   ;;  %1774 = vmatprep.subr.bf16.mxu1 %v4031_v3  ;;  %v4035_v6 = vld [vmem:[%s5785_s1 + $0x24] ss:$16 sps:$4 sm:$0xff]   ;;  %v4037_v10 = vld [vmem:[%s5785_s1 + $0x8] ss:$16 sps:$4 sm:$0xff]  }
  0x19   :  { %v50_v7 = vld [vmem:[%s5784_s0 + $0x30] sm:$0xff]  ;;  %1436 = vmatpush1.bf16.msra.mxu0 %v4033_v4  ;;  %1775 = vmatpush1.bf16.msra.mxu1 %v4034_v5  ;;  %v4039_v11 = vld [vmem:[%s5785_s1 + $0xc] ss:$16 sps:$4 sm:$0xff]   ;;  %v4043_v14 = vld [vmem:[%s5785_s1 + $0x28] ss:$16 sps:$4 sm:$0xff]  }
  0x1a   :  { %1437 = vmatprep.subr.bf16.mxu0 %v4035_v6  ;;  %v4554_v9 = vpack.c.bf16 %v57_v8, %v50_v7  ;;  %v4040_v12 = vld [vmem:[%s5785_s1 + $0x20] ss:$16 sps:$4 sm:$0xff]   ;;  %v4041_v13 = vld [vmem:[%s5785_s1 + $0x44] ss:$16 sps:$4 sm:$0xff]   ;;  %1887 = vmatprep.subr.bf16.mxu1 %v4039_v11  ;;  %v4045_v15 = vld [vmem:[%s5785_s1 + $0x2c] ss:$16 sps:$4 sm:$0xff]  }
  0x1b   :  { %v4046_v16 = vld [vmem:[%s5785_s1 + $0x40] ss:$16 sps:$4 sm:$0xff]   ;;  %v4047_v17 = vld [vmem:[%s5785_s1 + $0x64] ss:$16 sps:$4 sm:$0xff]   ;;  %v4049_v21 = vld [vmem:[%s5785_s1 + $0x48] ss:$16 sps:$4 sm:$0xff]  }
  0x1c   :  { %3591 = vmatmul.mubr.msk.bf16.vlgmr.msra.gmra.mrb[0].mxu1 %vm1410_vm0, %v4554_v9  ;;  %v64_v18 = vld [vmem:[%s5784_s0 + $0xa0] sm:$0xff]  ;;  %v4051_v22 = vld [vmem:[%s5785_s1 + $0x4c] ss:$16 sps:$4 sm:$0xff]   ;;  %v4055_v25 = vld [vmem:[%s5785_s1 + $0x68] ss:$16 sps:$4 sm:$0xff]  }
  0x1d   :  { %1438 = vmatpush1.bf16.msra.mxu0 %v4040_v12  ;;  %1888 = vmatpush1.bf16.msra.mxu1 %v4037_v10  ;;  %v4589_v20 = vpack.c.bf16 %v71_v19, %v64_v18  ;;  %v4052_v23 = vld [vmem:[%s5785_s1 + $0x60] ss:$16 sps:$4 sm:$0xff]   ;;  %v4053_v24 = vld [vmem:[%s5785_s1 + $0x84] ss:$16 sps:$4 sm:$0xff]   ;;  %v4057_v26 = vld [vmem:[%s5785_s1 + $0x6c] ss:$16 sps:$4 sm:$0xff]  }
  0x1e   :  { %1439 = vmatprep.subr.bf16.mxu0 %v4041_v13  ;;  %1816 = vmatprep.mubr.bf16.mxu1 %v4474_v1  ;;  %v4058_v27 = vld [vmem:[%s5785_s1 + $0x80] ss:$16 sps:$4 sm:$0xff]   ;;  %v85_v29 = vld [vmem:[%s5784_s0 + $0x148] sm:$0xff]  ;;  %v4059_v30 = vld [vmem:[%s5785_s1 + $0xa4] ss:$16 sps:$4 sm:$0xff]  }
  0x1f   :  { %1889 = vmatprep.subr.bf16.mxu1 %v4045_v15  ;;  %v78_v28 = vld [vmem:[%s5784_s0 + $0x110] sm:$0xff]  ;;  %v4063_v31 = vld [vmem:[%s5785_s1 + $0x8c] ss:$16 sps:$4 sm:$0xff]   ;;  %v4061_v33 = vld [vmem:[%s5785_s1 + $0x88] ss:$16 sps:$4 sm:$0xff]  }
  0x20   :  { %v4627_v32 = vpack.c.bf16 %v85_v29, %v78_v28  ;;  %v4064_v34 = vld [vmem:[%s5785_s1 + $0xa0] ss:$16 sps:$4 sm:$0xff]   ;;  %v4065_v35 = vld [vmem:[%s5785_s1 + $0xc4] ss:$16 sps:$4 sm:$0xff]   ;;  %v4069_v36 = vld [vmem:[%s5785_s1 + $0xac] ss:$16 sps:$4 sm:$0xff]  }
  0x21   :  { %1440 = vmatpush1.bf16.msra.mxu0 %v4046_v16  ;;  %1890 = vmatpush1.bf16.msra.mxu1 %v4043_v14  ;;  %v4067_v37 = vld [vmem:[%s5785_s1 + $0xa8] ss:$16 sps:$4 sm:$0xff]   ;;  %v4070_v38 = vld [vmem:[%s5785_s1 + $0xc0] ss:$16 sps:$4 sm:$0xff]   ;;  %v4071_v39 = vld [vmem:[%s5785_s1 + $0xe4] ss:$16 sps:$4 sm:$0xff]  }
  0x22   :  { %1441 = vmatprep.subr.bf16.mxu0 %v4047_v17  ;;  %1891 = vmatprep.subr.bf16.mxu1 %v4051_v22  ;;  %v92_v40 = vld [vmem:[%s5784_s0 + $0x180] sm:$0xff]  ;;  %v99_v41 = vld [vmem:[%s5784_s0 + $0x1b8] sm:$0xff]  ;;  %v106_v50 = vld [vmem:[%s5784_s0 + $0x1f0] sm:$0xff] }
  0x23   :  { %v4075_v42 = vld [vmem:[%s5785_s1 + $0xcc] ss:$16 sps:$4 sm:$0xff]   ;;  %v4662_v43 = vpack.c.bf16 %v99_v41, %v92_v40  ;;  %v4073_v44 = vld [vmem:[%s5785_s1 + $0xc8] ss:$16 sps:$4 sm:$0xff]   ;;  %v4076_v45 = vld [vmem:[%s5785_s1 + $0xe0] ss:$16 sps:$4 sm:$0xff]  }
  0x24   :  { %3592 = vmatmul.mubr.msk.bf16.gmra.mrb[4].mxu1 %vm1410_vm0, %v4589_v20  ;;  %v4077_v46 = vld [vmem:[%s5785_s1 + $0x104] ss:$16 sps:$4 sm:$0xff]   ;;  %v4081_v47 = vld [vmem:[%s5785_s1 + $0xec] ss:$16 sps:$4 sm:$0xff]   ;;  %v4079_v48 = vld [vmem:[%s5785_s1 + $0xe8] ss:$16 sps:$4 sm:$0xff]  }
  0x25   :  { %1442 = vmatpush1.bf16.msra.mxu0 %v4052_v23  ;;  %1892 = vmatpush1.bf16.msra.mxu1 %v4049_v21  ;;  %v4082_v49 = vld [vmem:[%s5785_s1 + $0x100] ss:$16 sps:$4 sm:$0xff]   ;;  %v113_v51 = vld [vmem:[%s5784_s0 + $0x228] sm:$0xff]  ;;  %v4083_v52 = vld [vmem:[%s5785_s1 + $0x124] ss:$16 sps:$4 sm:$0xff]  }
  0x26   :  { %1443 = vmatprep.subr.bf16.mxu0 %v4053_v24  ;;  %1893 = vmatprep.subr.bf16.mxu1 %v4057_v26  ;;  %v4087_v53 = vld [vmem:[%s5785_s1 + $0x10c] ss:$16 sps:$4 sm:$0xff]   ;;  %v4697_v54 = vpack.c.bf16 %v113_v51, %v106_v50  ;;  %v4085_v55 = vld [vmem:[%s5785_s1 + $0x108] ss:$16 sps:$4 sm:$0xff]   ;;  %v4088_v56 = vld [vmem:[%s5785_s1 + $0x120] ss:$16 sps:$4 sm:$0xff]  }
  0x27   :  { %1826 = vmatprep.mubr.bf16.mxu1 %v4474_v1  ;;  %v4089_v57 = vld [vmem:[%s5785_s1 + $0x144] ss:$16 sps:$4 sm:$0xff]   ;;  %v4093_v58 = vld [vmem:[%s5785_s1 + $0x12c] ss:$16 sps:$4 sm:$0xff]   ;;  %v4091_v59 = vld [vmem:[%s5785_s1 + $0x128] ss:$16 sps:$4 sm:$0xff]  }
  0x28   :  { %v4094_v60 = vld [vmem:[%s5785_s1 + $0x140] ss:$16 sps:$4 sm:$0xff]   ;;  %v127_v62 = vld [vmem:[%s5784_s0 + $0x298] sm:$0xff]  ;;  %v4095_v63 = vld [vmem:[%s5785_s1 + $0x164] ss:$16 sps:$4 sm:$0xff]  }
  0x29   :  { %1444 = vmatpush1.bf16.msra.mxu0 %v4058_v27  ;;  %1894 = vmatpush1.bf16.msra.mxu1 %v4055_v25  ;;  %v120_v61 = vld [vmem:[%s5784_s0 + $0x260] sm:$0xff]  ;;  %v4099_v0 = vld [vmem:[%s5785_s1 + $0x14c] ss:$16 sps:$4 sm:$0xff]   ;;  %v4097_v3 = vld [vmem:[%s5785_s1 + $0x148] ss:$16 sps:$4 sm:$0xff]  }
  0x2a   :  { %1445 = vmatprep.subr.bf16.mxu0 %v4059_v30  ;;  %1895 = vmatprep.subr.bf16.mxu1 %v4063_v31  ;;  %v4732_v2 = vpack.c.bf16 %v127_v62, %v120_v61  ;;  %v4100_v4 = vld [vmem:[%s5785_s1 + $0x160] ss:$16 sps:$4 sm:$0xff]   ;;  %v4101_v5 = vld [vmem:[%s5785_s1 + $0x184] ss:$16 sps:$4 sm:$0xff]   ;;  %v4105_v6 = vld [vmem:[%s5785_s1 + $0x16c] ss:$16 sps:$4 sm:$0xff]  }
  0x2b   :  { %v4103_v7 = vld [vmem:[%s5785_s1 + $0x168] ss:$16 sps:$4 sm:$0xff]   ;;  %v4106_v8 = vld [vmem:[%s5785_s1 + $0x180] ss:$16 sps:$4 sm:$0xff]   ;;  %v4107_v10 = vld [vmem:[%s5785_s1 + $0x1a4] ss:$16 sps:$4 sm:$0xff]  }
  0x2c   :  { %3593 = vmatmul.mubr.msk.bf16.gmra.mrb[8].mxu1 %vm1410_vm0, %v4627_v32  ;;  %v134_v11 = vld [vmem:[%s5784_s0 + $0x2d0] sm:$0xff]  ;;  %v141_v12 = vld [vmem:[%s5784_s0 + $0x308] sm:$0xff]  ;;  %v52_v14 = vld [vmem:[%s5784_s0 + $0x40] sm:$0xff] }
  0x2d   :  { %1446 = vmatpush1.bf16.msra.mxu0 %v4064_v34  ;;  %1896 = vmatpush1.bf16.msra.mxu1 %v4061_v33  ;;  %v45_v13 = vld [vmem:[%s5784_s0 + $0x8] sm:$0xff]  ;;  %v4773_v17 = vpack.c.bf16 %v141_v12, %v134_v11  ;;  %v4112_v19 = vld [vmem:[%s5785_s1 + $0x1a0] ss:$16 sps:$4 sm:$0xff]   ;;  %v4113_v21 = vld [vmem:[%s5785_s1 + $0x1c4] ss:$16 sps:$4 sm:$0xff]  }
  0x2e   :  { %1447 = vmatprep.subr.bf16.mxu0 %v4065_v35  ;;  %1897 = vmatprep.subr.bf16.mxu1 %v4069_v36  ;;  %v4111_v15 = vld [vmem:[%s5785_s1 + $0x18c] ss:$16 sps:$4 sm:$0xff]   ;;  %v157_v16 = vpack.c.bf16 %v52_v14, %v45_v13  ;;  %v4109_v18 = vld [vmem:[%s5785_s1 + $0x188] ss:$16 sps:$4 sm:$0xff]   ;;  %v4118_v24 = vld [vmem:[%s5785_s1 + $0x1c0] ss:$16 sps:$4 sm:$0xff]  }
  0x2f   :  { %1836 = vmatprep.mubr.bf16.mxu1 %v4474_v1  ;;  %v4117_v22 = vld [vmem:[%s5785_s1 + $0x1ac] ss:$16 sps:$4 sm:$0xff]   ;;  %v4115_v23 = vld [vmem:[%s5785_s1 + $0x1a8] ss:$16 sps:$4 sm:$0xff]   ;;  %v4119_v25 = vld [vmem:[%s5785_s1 + $0x1e4] ss:$16 sps:$4 sm:$0xff]  }
  0x30   :  { %1467 = vmatprep.mubr.bf16.mxu0 %v157_v16  ;;  %v148_v26 = vld [vmem:[%s5784_s0 + $0x340] sm:$0xff]  ;;  %v155_v27 = vld [vmem:[%s5784_s0 + $0x378] sm:$0xff]  ;;  %v66_v41 = vld [vmem:[%s5784_s0 + $0xb0] sm:$0xff] }
  0x31   :  { %1448 = vmatpush1.bf16.msra.mxu0 %v4070_v38  ;;  %1898 = vmatpush1.bf16.msra.mxu1 %v4067_v37  ;;  %v4123_v28 = vld [vmem:[%s5785_s1 + $0x1cc] ss:$16 sps:$4 sm:$0xff]   ;;  %v4121_v29 = vld [vmem:[%s5785_s1 + $0x1c8] ss:$16 sps:$4 sm:$0xff]   ;;  %v4811_v30 = vpack.c.bf16 %v155_v27, %v148_v26  ;;  %v4124_v31 = vld [vmem:[%s5785_s1 + $0x1e0] ss:$16 sps:$4 sm:$0xff]  }
  0x32   :  { %1449 = vmatprep.subr.bf16.mxu0 %v4071_v39  ;;  %1899 = vmatprep.subr.bf16.mxu1 %v4075_v42  ;;  %v44_v33 = vld [vmem:[%s5784_s0] sm:$0xff]  ;;  %v51_v34 = vld [vmem:[%s5784_s0 + $0x38] sm:$0xff] }
  0x33   :  { %v4127_v35 = vld [vmem:[%s5785_s1 + $0x204] ss:$16 sps:$4 sm:$0xff]   ;;  %v4130_v36 = vld [vmem:[%s5785_s1 + $0x1ec] ss:$16 sps:$4 sm:$0xff]   ;;  %v4125_v37 = vld [vmem:[%s5785_s1 + $0x200] ss:$16 sps:$4 sm:$0xff]   ;;  %v156_v39 = vpack.c.bf16 %v51_v34, %v44_v33 }
  0x34   :  { %3594 = vmatmul.mubr.msk.bf16.gmra.mrb[12].mxu1 %vm1410_vm0, %v4662_v43  ;;  %v4128_v38 = vld [vmem:[%s5785_s1 + $0x1e8] ss:$16 sps:$4 sm:$0xff]   ;;  %v4133_v42 = vld [vmem:[%s5785_s1 + $0x224] ss:$16 sps:$4 sm:$0xff]   ;;  %v4142_v51 = vld [vmem:[%s5785_s1 + $0x22c] ss:$16 sps:$4 sm:$0xff]  }
  0x35   :  { %1450 = vmatpush1.bf16.msra.mxu0 %v4076_v45  ;;  %1900 = vmatpush1.bf16.msra.mxu1 %v4073_v44  ;;  %v59_v40 = vld [vmem:[%s5784_s0 + $0x78] sm:$0xff]  ;;  %v4139_v50 = vld [vmem:[%s5785_s1 + $0x244] ss:$16 sps:$4 sm:$0xff]   ;;  %v4155_v13 = vld [vmem:[%s5785_s1 + $0x2a0] ss:$16 sps:$4 sm:$0xff]  }
  0x36   :  { %1451 = vmatprep.subr.bf16.mxu0 %v4077_v46  ;;  %1901 = vmatprep.subr.bf16.mxu1 %v4081_v47  ;;  %v4136_v44 = vld [vmem:[%s5785_s1 + $0x20c] ss:$16 sps:$4 sm:$0xff]   ;;  %v164_v45 = vpack.c.bf16 %v66_v41, %v59_v40  ;;  %v4131_v46 = vld [vmem:[%s5785_s1 + $0x220] ss:$16 sps:$4 sm:$0xff]   ;;  %v4134_v47 = vld [vmem:[%s5785_s1 + $0x208] ss:$16 sps:$4 sm:$0xff]  }
  0x37   :  { %1846 = vmatprep.mubr.bf16.mxu1 %v4474_v1  ;;  %v4146_v62 = vld [vmem:[%s5785_s1 + $0x248] ss:$16 sps:$4 sm:$0xff]   ;;  %v4157_v11 = vld [vmem:[%s5785_s1 + $0x2a4] ss:$16 sps:$4 sm:$0xff]   ;;  %v4160_v12 = vld [vmem:[%s5785_s1 + $0x28c] ss:$16 sps:$4 sm:$0xff]  }
  0x38   :  { %v4158_v14 = vld [vmem:[%s5785_s1 + $0x288] ss:$16 sps:$4 sm:$0xff]   ;;  %v4169_v27 = vld [vmem:[%s5785_s1 + $0x2e4] ss:$16 sps:$4 sm:$0xff]  }
  0x39   :  { %1452 = vmatpush1.bf16.msra.mxu0 %v4082_v49  ;;  %1902 = vmatpush1.bf16.msra.mxu1 %v4079_v48  ;;  %v58_v48 = vld [vmem:[%s5784_s0 + $0x70] sm:$0xff]  ;;  %v65_v49 = vld [vmem:[%s5784_s0 + $0xa8] sm:$0xff]  ;;  %v100_v34 = vld [vmem:[%s5784_s0 + $0x1c0] sm:$0xff] }
  0x3a   :  { %1453 = vmatprep.subr.bf16.mxu0 %v4083_v52  ;;  %1903 = vmatprep.subr.bf16.mxu1 %v4087_v53  ;;  %v4137_v52 = vld [vmem:[%s5785_s1 + $0x240] ss:$16 sps:$4 sm:$0xff]   ;;  %v4140_v53 = vld [vmem:[%s5785_s1 + $0x228] ss:$16 sps:$4 sm:$0xff]  }
  0x3b   :  { %v4164_v26 = vld [vmem:[%s5785_s1 + $0x2a8] ss:$16 sps:$4 sm:$0xff]  }
  0x3c   :  { %3595 = vmatmul.mubr.msk.bf16.gmra.mrb[16].mxu1 %vm1410_vm0, %v4697_v54  ;;  %v4176_v40 = vld [vmem:[%s5785_s1 + $0x2e8] ss:$16 sps:$4 sm:$0xff]  }
  0x3d   :  { %1454 = vmatpush1.bf16.msra.mxu0 %v4088_v56  ;;  %1904 = vmatpush1.bf16.msra.mxu1 %v4085_v55  ;;  %v163_v55 = vpack.c.bf16 %v65_v49, %v58_v48  ;;  %v73_v56 = vld [vmem:[%s5784_s0 + $0xe8] sm:$0xff]  ;;  %v115_v41 = vld [vmem:[%s5784_s0 + $0x238] sm:$0xff]  ;;  %v114_v49 = vld [vmem:[%s5784_s0 + $0x230] sm:$0xff] }
  0x3e   :  { %1455 = vmatprep.subr.bf16.mxu0 %v4089_v57  ;;  %1905 = vmatprep.subr.bf16.mxu1 %v4093_v58  ;;  %v80_v57 = vld [vmem:[%s5784_s0 + $0x120] sm:$0xff]  ;;  %v4182_v48 = vld [vmem:[%s5785_s1 + $0x308] ss:$16 sps:$4 sm:$0xff]  }
  0x3f   :  { %1856 = vmatprep.mubr.bf16.mxu1 %v4474_v1  ;;  %v4145_v58 = vld [vmem:[%s5785_s1 + $0x264] ss:$16 sps:$4 sm:$0xff]   ;;  %v171_v61 = vpack.c.bf16 %v80_v57, %v73_v56  ;;  %v129_v57 = vld [vmem:[%s5784_s0 + $0x2a8] sm:$0xff] }
  0x41   :  { %1456 = vmatpush1.bf16.msra.mxu0 %v4094_v60  ;;  %1906 = vmatpush1.bf16.msra.mxu1 %v4091_v59  ;;  %v4148_v59 = vld [vmem:[%s5785_s1 + $0x24c] ss:$16 sps:$4 sm:$0xff]   ;;  %v4143_v60 = vld [vmem:[%s5785_s1 + $0x260] ss:$16 sps:$4 sm:$0xff]  }
  0x42   :  { %1457 = vmatprep.subr.bf16.mxu0 %v4095_v63  ;;  %1907 = vmatprep.subr.bf16.mxu1 %v4099_v0  ;;  %v72_v63 = vld [vmem:[%s5784_s0 + $0xe0] sm:$0xff]  ;;  %v79_v0 = vld [vmem:[%s5784_s0 + $0x118] sm:$0xff] }
  0x44   :  { %3596 = vmatmul.mubr.msk.bf16.gmra.mrb[20].mxu1 %vm1410_vm0, %v4732_v2 }
  0x45   :  { %1458 = vmatpush1.bf16.msra.mxu0 %v4100_v4  ;;  %1908 = vmatpush1.bf16.msra.mxu1 %v4097_v3  ;;  %v4151_v3 = vld [vmem:[%s5785_s1 + $0x284] ss:$16 sps:$4 sm:$0xff]   ;;  %v4154_v4 = vld [vmem:[%s5785_s1 + $0x26c] ss:$16 sps:$4 sm:$0xff]  }
  0x46   :  { %1459 = vmatprep.subr.bf16.mxu0 %v4101_v5  ;;  %1909 = vmatprep.subr.bf16.mxu1 %v4105_v6  ;;  %v4149_v5 = vld [vmem:[%s5785_s1 + $0x280] ss:$16 sps:$4 sm:$0xff]   ;;  %v170_v6 = vpack.c.bf16 %v79_v0, %v72_v63  ;;  %v4194_v63 = vld [vmem:[%s5785_s1 + $0x348] ss:$16 sps:$4 sm:$0xff]  }
  0x47   :  { %1866 = vmatprep.mubr.bf16.mxu1 %v4474_v1  ;;  %v128_v0 = vld [vmem:[%s5784_s0 + $0x2a0] sm:$0xff] }
  0x49   :  { %1460 = vmatpush1.bf16.msra.mxu0 %v4106_v8  ;;  %1910 = vmatpush1.bf16.msra.mxu1 %v4103_v7  ;;  %v87_v7 = vld [vmem:[%s5784_s0 + $0x158] sm:$0xff]  ;;  %v94_v8 = vld [vmem:[%s5784_s0 + $0x190] sm:$0xff] }
  0x4a   :  { %1461 = vmatprep.subr.bf16.mxu0 %v4107_v10  ;;  %1911 = vmatprep.subr.bf16.mxu1 %v4111_v15  ;;  %v4152_v10 = vld [vmem:[%s5785_s1 + $0x268] ss:$16 sps:$4 sm:$0xff]   ;;  %v178_v15 = vpack.c.bf16 %v94_v8, %v87_v7 }
  0x4b   :  { %v4200_v7 = vld [vmem:[%s5785_s1 + $0x368] ss:$16 sps:$4 sm:$0xff]  }
  0x4c   :  { %3597 = vmatmul.mubr.msk.bf16.gmra.mrb[24].mxu1 %vm1410_vm0, %v4773_v17 }
  0x4d   :  { %1462 = vmatpush1.bf16.msra.mxu0 %v4112_v19  ;;  %1912 = vmatpush1.bf16.msra.mxu1 %v4109_v18  ;;  %v93_v18 = vld [vmem:[%s5784_s0 + $0x188] sm:$0xff]  ;;  %v4163_v19 = vld [vmem:[%s5785_s1 + $0x2c4] ss:$16 sps:$4 sm:$0xff]  }
  0x4e   :  { %1463 = vmatprep.subr.bf16.mxu0 %v4113_v21  ;;  %1913 = vmatprep.subr.bf16.mxu1 %v4117_v22  ;;  %v4166_v21 = vld [vmem:[%s5785_s1 + $0x2ac] ss:$16 sps:$4 sm:$0xff]  }
  0x4f   :  { %1876 = vmatprep.mubr.bf16.mxu1 %v4474_v1 }
  0x51   :  { %1464 = vmatpush1.bf16.msra.mxu0 %v4118_v24  ;;  %1914 = vmatpush1.bf16.msra.mxu1 %v4115_v23  ;;  %v101_v23 = vld [vmem:[%s5784_s0 + $0x1c8] sm:$0xff]  ;;  %v108_v24 = vld [vmem:[%s5784_s0 + $0x200] sm:$0xff] }
  0x52   :  { %1465 = vmatprep.subr.bf16.mxu0 %v4119_v25  ;;  %1915 = vmatprep.subr.bf16.mxu1 %v4123_v28  ;;  %v4161_v25 = vld [vmem:[%s5785_s1 + $0x2c0] ss:$16 sps:$4 sm:$0xff]   ;;  %v4172_v28 = vld [vmem:[%s5785_s1 + $0x2cc] ss:$16 sps:$4 sm:$0xff]   ;;  %v185_v33 = vpack.c.bf16 %v108_v24, %v101_v23 }
  0x53   :  { %v4209_v23 = vld [vmem:[%s5785_s1 + $0x3c0] ss:$16 sps:$4 sm:$0xff]  }
  0x54   :  { %3598 = vmatmul.mubr.msk.bf16.gmra.mrb[28].mxu1 %vm1410_vm0, %v4811_v30 }
  0x55   :  { %1466 = vmatpush1.bf16.msra.mxu0 %v4124_v31  ;;  %1916 = vmatpush1.bf16.msra.mxu1 %v4121_v29  ;;  %v4167_v29 = vld [vmem:[%s5785_s1 + $0x2e0] ss:$16 sps:$4 sm:$0xff]   ;;  %v4170_v31 = vld [vmem:[%s5785_s1 + $0x2c8] ss:$16 sps:$4 sm:$0xff]  }
  0x56   :  { %1548 = vmatprep.subr.bf16.mxu0 %v4127_v35  ;;  %1917 = vmatprep.subr.bf16.mxu1 %v4130_v36  ;;  %v107_v35 = vld [vmem:[%s5784_s0 + $0x1f8] sm:$0xff]  ;;  %v4175_v36 = vld [vmem:[%s5785_s1 + $0x304] ss:$16 sps:$4 sm:$0xff]  }
  0x57   :  { %1919 = vmatprep.mubr.bf16.mxu1 %v157_v16  ;;  %v86_v16 = vld [vmem:[%s5784_s0 + $0x150] sm:$0xff] }
  0x58   :  { %1468 = vmatmul.mubr.bf16.vlgmr.msra.gmra.mrb[0].mxu0 %v156_v39  ;;  %v177_v22 = vpack.c.bf16 %v93_v18, %v86_v16  ;;  %v4206_v16 = vld [vmem:[%s5785_s1 + $0x388] ss:$16 sps:$4 sm:$0xff]   ;;  %v142_v18 = vld [vmem:[%s5784_s0 + $0x310] sm:$0xff] }
  0x59   :  { %1549 = vmatpush1.bf16.msra.mxu0 %v4125_v37  ;;  %1918 = vmatpush1.bf16.msra.mxu1 %v4128_v38  ;;  %v4178_v37 = vld [vmem:[%s5785_s1 + $0x2ec] ss:$16 sps:$4 sm:$0xff]   ;;  %v4173_v38 = vld [vmem:[%s5785_s1 + $0x300] ss:$16 sps:$4 sm:$0xff]  }
  0x5a   :  { %1550 = vmatprep.subr.bf16.mxu0 %v4133_v42  ;;  %2000 = vmatprep.subr.bf16.mxu1 %v4136_v44  ;;  %v122_v42 = vld [vmem:[%s5784_s0 + $0x270] sm:$0xff] }
  0x5b   :  { %1477 = vmatprep.mubr.bf16.mxu0 %v164_v45  ;;  %v4181_v44 = vld [vmem:[%s5785_s1 + $0x324] ss:$16 sps:$4 sm:$0xff]  }
  0x5c   :  { %1920 = vmatmul.mubr.bf16.vlgmr.msra.gmra.mrb[32].mxu1 %v156_v39  ;;  %v184_v39 = vpack.c.bf16 %v107_v35, %v100_v34  ;;  %v46_v35 = vld [vmem:[%s5784_s0 + $0x10] sm:$0xff] }
  0x5d   :  { %1551 = vmatpush1.bf16.msra.mxu0 %v4131_v46  ;;  %2001 = vmatpush1.bf16.msra.mxu1 %v4134_v47  ;;  %v4179_v46 = vld [vmem:[%s5785_s1 + $0x320] ss:$16 sps:$4 sm:$0xff]   ;;  %v192_v47 = vpack.c.bf16 %v122_v42, %v115_v41 }
  0x5e   :  { %1552 = vmatprep.subr.bf16.mxu0 %v4139_v50  ;;  %2002 = vmatprep.subr.bf16.mxu1 %v4142_v51  ;;  %v121_v50 = vld [vmem:[%s5784_s0 + $0x268] sm:$0xff]  ;;  %v4187_v51 = vld [vmem:[%s5785_s1 + $0x344] ss:$16 sps:$4 sm:$0xff]   ;;  %v4221_v42 = vld [vmem:[%s5785_s1 + $0x400] ss:$16 sps:$4 sm:$0xff]  }
  0x5f   :  { %1929 = vmatprep.mubr.bf16.mxu1 %v164_v45  ;;  %v4184_v45 = vld [vmem:[%s5785_s1 + $0x30c] ss:$16 sps:$4 sm:$0xff]   ;;  %v191_v56 = vpack.c.bf16 %v121_v50, %v114_v49  ;;  %v68_v41 = vld [vmem:[%s5784_s0 + $0xc0] sm:$0xff] }
  0x60   :  { %1478 = vmatmul.mubr.bf16.gmra.mrb[4].mxu0 %v163_v55  ;;  %v60_v50 = vld [vmem:[%s5784_s0 + $0x80] sm:$0xff] }
  0x61   :  { %1553 = vmatpush1.bf16.msra.mxu0 %v4137_v52  ;;  %2003 = vmatpush1.bf16.msra.mxu1 %v4140_v53  ;;  %v4190_v52 = vld [vmem:[%s5785_s1 + $0x32c] ss:$16 sps:$4 sm:$0xff]   ;;  %v4185_v53 = vld [vmem:[%s5785_s1 + $0x340] ss:$16 sps:$4 sm:$0xff]  }
  0x62   :  { %1554 = vmatprep.subr.bf16.mxu0 %v4145_v58  ;;  %2004 = vmatprep.subr.bf16.mxu1 %v4148_v59  ;;  %v136_v58 = vld [vmem:[%s5784_s0 + $0x2e0] sm:$0xff] }
  0x63   :  { %1487 = vmatprep.mubr.bf16.mxu0 %v171_v61  ;;  %v4193_v59 = vld [vmem:[%s5785_s1 + $0x364] ss:$16 sps:$4 sm:$0xff]  }
  0x64   :  { %1930 = vmatmul.mubr.bf16.gmra.mrb[36].mxu1 %v163_v55  ;;  %v4188_v55 = vld [vmem:[%s5785_s1 + $0x328] ss:$16 sps:$4 sm:$0xff]  }
  0x65   :  { %1555 = vmatpush1.bf16.msra.mxu0 %v4143_v60  ;;  %2005 = vmatpush1.bf16.msra.mxu1 %v4146_v62  ;;  %v4196_v60 = vld [vmem:[%s5785_s1 + $0x34c] ss:$16 sps:$4 sm:$0xff]   ;;  %v4191_v62 = vld [vmem:[%s5785_s1 + $0x360] ss:$16 sps:$4 sm:$0xff]  }
  0x66   :  { %1556 = vmatprep.subr.bf16.mxu0 %v4151_v3  ;;  %2006 = vmatprep.subr.bf16.mxu1 %v4154_v4  ;;  %v135_v3 = vld [vmem:[%s5784_s0 + $0x2d8] sm:$0xff]  ;;  %v4199_v4 = vld [vmem:[%s5785_s1 + $0x384] ss:$16 sps:$4 sm:$0xff]  }
  0x67   :  { %1939 = vmatprep.mubr.bf16.mxu1 %v171_v61  ;;  %v199_v61 = vpack.c.bf16 %v136_v58, %v129_v57  ;;  %v198_v8 = vpack.c.bf16 %v135_v3, %v128_v0  ;;  %v4236_v57 = vld [vmem:[%s5785_s1 + $0x428] ss:$16 sps:$4 sm:$0xff]   ;;  %v74_v3 = vld [vmem:[%s5784_s0 + $0xf0] sm:$0xff] }
  0x68   :  { %1488 = vmatmul.mubr.bf16.gmra.mrb[8].mxu0 %v170_v6  ;;  %v75_v58 = vld [vmem:[%s5784_s0 + $0xf8] sm:$0xff] }
  0x69   :  { %1557 = vmatpush1.bf16.msra.mxu0 %v4149_v5  ;;  %2007 = vmatpush1.bf16.msra.mxu1 %v4152_v10  ;;  %v4202_v5 = vld [vmem:[%s5785_s1 + $0x36c] ss:$16 sps:$4 sm:$0xff]   ;;  %v4242_v0 = vld [vmem:[%s5785_s1 + $0x448] ss:$16 sps:$4 sm:$0xff]  }
  0x6a   :  { %1558 = vmatprep.subr.bf16.mxu0 %v4157_v11  ;;  %2008 = vmatprep.subr.bf16.mxu1 %v4160_v12  ;;  %v143_v10 = vld [vmem:[%s5784_s0 + $0x318] sm:$0xff]  ;;  %v150_v11 = vld [vmem:[%s5784_s0 + $0x350] sm:$0xff] }
  0x6b   :  { %1497 = vmatprep.mubr.bf16.mxu0 %v178_v15  ;;  %v4205_v12 = vld [vmem:[%s5785_s1 + $0x3a4] ss:$16 sps:$4 sm:$0xff]  }
  0x6c   :  { %1940 = vmatmul.mubr.bf16.gmra.mrb[40].mxu1 %v170_v6  ;;  %v4197_v6 = vld [vmem:[%s5785_s1 + $0x380] ss:$16 sps:$4 sm:$0xff]  }
  0x6d   :  { %1559 = vmatpush1.bf16.msra.mxu0 %v4155_v13  ;;  %2009 = vmatpush1.bf16.msra.mxu1 %v4158_v14  ;;  %v4208_v13 = vld [vmem:[%s5785_s1 + $0x38c] ss:$16 sps:$4 sm:$0xff]   ;;  %v4203_v14 = vld [vmem:[%s5785_s1 + $0x3a0] ss:$16 sps:$4 sm:$0xff]  }
  0x6e   :  { %1560 = vmatprep.subr.bf16.mxu0 %v4163_v19  ;;  %2010 = vmatprep.subr.bf16.mxu1 %v4166_v21  ;;  %v149_v19 = vld [vmem:[%s5784_s0 + $0x348] sm:$0xff]  ;;  %v4211_v21 = vld [vmem:[%s5785_s1 + $0x3c4] ss:$16 sps:$4 sm:$0xff]  }
  0x6f   :  { %1949 = vmatprep.mubr.bf16.mxu1 %v178_v15  ;;  %v206_v15 = vpack.c.bf16 %v150_v11, %v143_v10  ;;  %v205_v24 = vpack.c.bf16 %v149_v19, %v142_v18  ;;  %v89_v11 = vld [vmem:[%s5784_s0 + $0x168] sm:$0xff]  ;;  %v88_v19 = vld [vmem:[%s5784_s0 + $0x160] sm:$0xff] }
  0x70   :  { %1498 = vmatmul.mubr.bf16.gmra.mrb[12].mxu0 %v177_v22  ;;  %v4254_v18 = vld [vmem:[%s5785_s1 + $0x488] ss:$16 sps:$4 sm:$0xff]  }
  0x71   :  { %1561 = vmatpush1.bf16.msra.mxu0 %v4161_v25  ;;  %2011 = vmatpush1.bf16.msra.mxu1 %v4164_v26  ;;  %v47_v25 = vld [vmem:[%s5784_s0 + $0x18] sm:$0xff]  ;;  %v54_v26 = vld [vmem:[%s5784_s0 + $0x50] sm:$0xff] }
  0x72   :  { %1562 = vmatprep.subr.bf16.mxu0 %v4169_v27  ;;  %2012 = vmatprep.subr.bf16.mxu1 %v4172_v28  ;;  %v4212_v27 = vld [vmem:[%s5785_s1 + $0x3a8] ss:$16 sps:$4 sm:$0xff]   ;;  %v4217_v28 = vld [vmem:[%s5785_s1 + $0x3e4] ss:$16 sps:$4 sm:$0xff]   ;;  %v159_v34 = vpack.c.bf16 %v54_v26, %v47_v25 }
  0x73   :  { %1507 = vmatprep.mubr.bf16.mxu0 %v185_v33  ;;  %v4260_v25 = vld [vmem:[%s5785_s1 + $0x4a8] ss:$16 sps:$4 sm:$0xff]  }
  0x74   :  { %1950 = vmatmul.mubr.bf16.gmra.mrb[44].mxu1 %v177_v22  ;;  %v4214_v22 = vld [vmem:[%s5785_s1 + $0x3ac] ss:$16 sps:$4 sm:$0xff]  }
  0x75   :  { %1563 = vmatpush1.bf16.msra.mxu0 %v4167_v29  ;;  %2013 = vmatpush1.bf16.msra.mxu1 %v4170_v31  ;;  %v4220_v29 = vld [vmem:[%s5785_s1 + $0x3cc] ss:$16 sps:$4 sm:$0xff]   ;;  %v4215_v31 = vld [vmem:[%s5785_s1 + $0x3e0] ss:$16 sps:$4 sm:$0xff]  }
  0x76   :  { %1564 = vmatprep.subr.bf16.mxu0 %v4175_v36  ;;  %2014 = vmatprep.subr.bf16.mxu1 %v4178_v37  ;;  %v53_v36 = vld [vmem:[%s5784_s0 + $0x48] sm:$0xff]  ;;  %v4223_v37 = vld [vmem:[%s5785_s1 + $0x404] ss:$16 sps:$4 sm:$0xff]  }
  0x77   :  { %1959 = vmatprep.mubr.bf16.mxu1 %v185_v33  ;;  %v4218_v33 = vld [vmem:[%s5785_s1 + $0x3c8] ss:$16 sps:$4 sm:$0xff]  }
  0x78   :  { %1508 = vmatmul.mubr.bf16.gmra.mrb[16].mxu0 %v184_v39 }
  0x79   :  { %1565 = vmatpush1.bf16.msra.mxu0 %v4173_v38  ;;  %2015 = vmatpush1.bf16.msra.mxu1 %v4176_v40  ;;  %v4226_v38 = vld [vmem:[%s5785_s1 + $0x3ec] ss:$16 sps:$4 sm:$0xff]  }
  0x7a   :  { %1566 = vmatprep.subr.bf16.mxu0 %v4181_v44  ;;  %2016 = vmatprep.subr.bf16.mxu1 %v4184_v45  ;;  %v61_v40 = vld [vmem:[%s5784_s0 + $0x88] sm:$0xff]  ;;  %v4229_v45 = vld [vmem:[%s5785_s1 + $0x424] ss:$16 sps:$4 sm:$0xff]  }
  0x7b   :  { %1517 = vmatprep.mubr.bf16.mxu0 %v192_v47  ;;  %v4224_v44 = vld [vmem:[%s5785_s1 + $0x3e8] ss:$16 sps:$4 sm:$0xff]   ;;  %v166_v49 = vpack.c.bf16 %v68_v41, %v61_v40 }
  0x7c   :  { %1960 = vmatmul.mubr.bf16.gmra.mrb[48].mxu1 %v184_v39  ;;  %v158_v39 = vpack.c.bf16 %v53_v36, %v46_v35  ;;  %v4266_v35 = vld [vmem:[%s5785_s1 + $0x4c8] ss:$16 sps:$4 sm:$0xff]   ;;  %v102_v36 = vld [vmem:[%s5784_s0 + $0x1d0] sm:$0xff] }
  0x7d   :  { %1567 = vmatpush1.bf16.msra.mxu0 %v4179_v46  ;;  %2017 = vmatpush1.bf16.msra.mxu1 %v4182_v48  ;;  %v4232_v46 = vld [vmem:[%s5785_s1 + $0x40c] ss:$16 sps:$4 sm:$0xff]   ;;  %v4230_v48 = vld [vmem:[%s5785_s1 + $0x408] ss:$16 sps:$4 sm:$0xff]  }
  0x7e   :  { %1568 = vmatprep.subr.bf16.mxu0 %v4187_v51  ;;  %2018 = vmatprep.subr.bf16.mxu1 %v4190_v52  ;;  %v67_v51 = vld [vmem:[%s5784_s0 + $0xb8] sm:$0xff]  ;;  %v4235_v52 = vld [vmem:[%s5785_s1 + $0x444] ss:$16 sps:$4 sm:$0xff]   ;;  %v117_v41 = vld [vmem:[%s5784_s0 + $0x248] sm:$0xff] }
  0x7f   :  { %1969 = vmatprep.mubr.bf16.mxu1 %v192_v47  ;;  %v4227_v47 = vld [vmem:[%s5785_s1 + $0x420] ss:$16 sps:$4 sm:$0xff]  }
  0x80   :  { %1518 = vmatmul.mubr.bf16.gmra.mrb[20].mxu0 %v191_v56 }
  0x81   :  { %1569 = vmatpush1.bf16.msra.mxu0 %v4185_v53  ;;  %2019 = vmatpush1.bf16.msra.mxu1 %v4188_v55  ;;  %v4238_v53 = vld [vmem:[%s5785_s1 + $0x42c] ss:$16 sps:$4 sm:$0xff]   ;;  %v4233_v55 = vld [vmem:[%s5785_s1 + $0x440] ss:$16 sps:$4 sm:$0xff]  }
  0x82   :  { %1570 = vmatprep.subr.bf16.mxu0 %v4193_v59  ;;  %2020 = vmatprep.subr.bf16.mxu1 %v4196_v60  ;;  %v82_v59 = vld [vmem:[%s5784_s0 + $0x130] sm:$0xff] }
  0x83   :  { %1527 = vmatprep.mubr.bf16.mxu0 %v199_v61  ;;  %v4241_v60 = vld [vmem:[%s5785_s1 + $0x464] ss:$16 sps:$4 sm:$0xff]  }
  0x84   :  { %1970 = vmatmul.mubr.bf16.gmra.mrb[52].mxu1 %v191_v56  ;;  %v165_v56 = vpack.c.bf16 %v67_v51, %v60_v50  ;;  %v4278_v50 = vld [vmem:[%s5785_s1 + $0x508] ss:$16 sps:$4 sm:$0xff]   ;;  %v116_v51 = vld [vmem:[%s5784_s0 + $0x240] sm:$0xff] }
  0x85   :  { %1571 = vmatpush1.bf16.msra.mxu0 %v4191_v62  ;;  %2021 = vmatpush1.bf16.msra.mxu1 %v4194_v63  ;;  %v4239_v62 = vld [vmem:[%s5785_s1 + $0x460] ss:$16 sps:$4 sm:$0xff]   ;;  %v173_v63 = vpack.c.bf16 %v82_v59, %v75_v58  ;;  %v4289_v59 = vld [vmem:[%s5785_s1 + $0x564] ss:$16 sps:$4 sm:$0xff]  }
  0x86   :  { %1572 = vmatprep.subr.bf16.mxu0 %v4199_v4  ;;  %2022 = vmatprep.subr.bf16.mxu1 %v4202_v5  ;;  %v81_v4 = vld [vmem:[%s5784_s0 + $0x128] sm:$0xff]  ;;  %v4247_v5 = vld [vmem:[%s5785_s1 + $0x484] ss:$16 sps:$4 sm:$0xff]  }
  0x87   :  { %1979 = vmatprep.mubr.bf16.mxu1 %v199_v61  ;;  %v4244_v61 = vld [vmem:[%s5785_s1 + $0x44c] ss:$16 sps:$4 sm:$0xff]   ;;  %v172_v10 = vpack.c.bf16 %v81_v4, %v74_v3  ;;  %v130_v4 = vld [vmem:[%s5784_s0 + $0x2b0] sm:$0xff] }
  0x88   :  { %1528 = vmatmul.mubr.bf16.gmra.mrb[24].mxu0 %v198_v8 }
  0x89   :  { %1573 = vmatpush1.bf16.msra.mxu0 %v4197_v6  ;;  %2023 = vmatpush1.bf16.msra.mxu1 %v4200_v7  ;;  %v4250_v6 = vld [vmem:[%s5785_s1 + $0x46c] ss:$16 sps:$4 sm:$0xff]   ;;  %v4245_v7 = vld [vmem:[%s5785_s1 + $0x480] ss:$16 sps:$4 sm:$0xff]  }
  0x8a   :  { %1574 = vmatprep.subr.bf16.mxu0 %v4205_v12  ;;  %2024 = vmatprep.subr.bf16.mxu1 %v4208_v13  ;;  %v96_v12 = vld [vmem:[%s5784_s0 + $0x1a0] sm:$0xff] }
  0x8b   :  { %1537 = vmatprep.mubr.bf16.mxu0 %v206_v15  ;;  %v4253_v13 = vld [vmem:[%s5785_s1 + $0x4a4] ss:$16 sps:$4 sm:$0xff]  }
  0x8c   :  { %1980 = vmatmul.mubr.bf16.gmra.mrb[56].mxu1 %v198_v8  ;;  %v4248_v8 = vld [vmem:[%s5785_s1 + $0x468] ss:$16 sps:$4 sm:$0xff]  }
  0x8d   :  { %1575 = vmatpush1.bf16.msra.mxu0 %v4203_v14  ;;  %2025 = vmatpush1.bf16.msra.mxu1 %v4206_v16  ;;  %v4256_v14 = vld [vmem:[%s5785_s1 + $0x48c] ss:$16 sps:$4 sm:$0xff]   ;;  %v4251_v16 = vld [vmem:[%s5785_s1 + $0x4a0] ss:$16 sps:$4 sm:$0xff]  }
  0x8e   :  { %1576 = vmatprep.subr.bf16.mxu0 %v4211_v21  ;;  %2026 = vmatprep.subr.bf16.mxu1 %v4214_v22  ;;  %v95_v21 = vld [vmem:[%s5784_s0 + $0x198] sm:$0xff]  ;;  %v4259_v22 = vld [vmem:[%s5785_s1 + $0x4c4] ss:$16 sps:$4 sm:$0xff]  }
  0x8f   :  { %1989 = vmatprep.mubr.bf16.mxu1 %v206_v15  ;;  %v180_v15 = vpack.c.bf16 %v96_v12, %v89_v11  ;;  %v179_v26 = vpack.c.bf16 %v95_v21, %v88_v19  ;;  %v4293_v11 = vld [vmem:[%s5785_s1 + $0x580] ss:$16 sps:$4 sm:$0xff]   ;;  %v4296_v12 = vld [vmem:[%s5785_s1 + $0x568] ss:$16 sps:$4 sm:$0xff]  }
  0x90   :  { %1538 = vmatmul.mubr.bf16.gmra.mrb[28].mxu0 %v205_v24  ;;  %v144_v21 = vld [vmem:[%s5784_s0 + $0x320] sm:$0xff] }
  0x91   :  { %1577 = vmatpush1.bf16.msra.mxu0 %v4209_v23  ;;  %2027 = vmatpush1.bf16.msra.mxu1 %v4212_v27  ;;  %v4262_v23 = vld [vmem:[%s5785_s1 + $0x4ac] ss:$16 sps:$4 sm:$0xff]  }
  0x92   :  { %1578 = vmatprep.subr.bf16.mxu0 %v4217_v28  ;;  %2028 = vmatprep.subr.bf16.mxu1 %v4220_v29  ;;  %v103_v27 = vld [vmem:[%s5784_s0 + $0x1d8] sm:$0xff]  ;;  %v110_v28 = vld [vmem:[%s5784_s0 + $0x210] sm:$0xff] }
  0x93   :  { %1580 = vmatprep.mubr.bf16.mxu0 %v159_v34  ;;  %v4265_v29 = vld [vmem:[%s5785_s1 + $0x4e4] ss:$16 sps:$4 sm:$0xff]  }
  0x94   :  { %1990 = vmatmul.mubr.bf16.gmra.mrb[60].mxu1 %v205_v24  ;;  %v4257_v24 = vld [vmem:[%s5785_s1 + $0x4c0] ss:$16 sps:$4 sm:$0xff]  }
  0x95   :  { %1579 = vmatpush1.bf16.msra.mxu0 %v4215_v31  ;;  %2029 = vmatpush1.bf16.msra.mxu1 %v4218_v33  ;;  %v4268_v31 = vld [vmem:[%s5785_s1 + $0x4cc] ss:$16 sps:$4 sm:$0xff]   ;;  %v4263_v33 = vld [vmem:[%s5785_s1 + $0x4e0] ss:$16 sps:$4 sm:$0xff]  }
  0x96   :  { %1661 = vmatprep.subr.bf16.mxu0 %v4223_v37  ;;  %2030 = vmatprep.subr.bf16.mxu1 %v4226_v38  ;;  %v109_v37 = vld [vmem:[%s5784_s0 + $0x208] sm:$0xff]  ;;  %v4271_v38 = vld [vmem:[%s5785_s1 + $0x504] ss:$16 sps:$4 sm:$0xff]  }
  0x97   :  { %2032 = vmatprep.mubr.bf16.mxu1 %v159_v34  ;;  %v187_v34 = vpack.c.bf16 %v110_v28, %v103_v27  ;;  %v186_v40 = vpack.c.bf16 %v109_v37, %v102_v36  ;;  %v4305_v27 = vld [vmem:[%s5785_s1 + $0x5c0] ss:$16 sps:$4 sm:$0xff]   ;;  %v4308_v28 = vld [vmem:[%s5785_s1 + $0x5a8] ss:$16 sps:$4 sm:$0xff]  }
  0x98   :  { %1581 = vmatmul.mubr.bf16.vlgmr.msra.gmra.mrb[0].mxu0 %v158_v39  ;;  %v48_v37 = vld [vmem:[%s5784_s0 + $0x20] sm:$0xff] }
  0x99   :  { %1662 = vmatpush1.bf16.msra.mxu0 %v4221_v42  ;;  %2031 = vmatpush1.bf16.msra.mxu1 %v4224_v44  ;;  %v124_v42 = vld [vmem:[%s5784_s0 + $0x280] sm:$0xff] }
  0x9a   :  { %1663 = vmatprep.subr.bf16.mxu0 %v4229_v45  ;;  %2113 = vmatprep.subr.bf16.mxu1 %v4232_v46  ;;  %v4269_v44 = vld [vmem:[%s5785_s1 + $0x500] ss:$16 sps:$4 sm:$0xff]   ;;  %v4272_v45 = vld [vmem:[%s5785_s1 + $0x4e8] ss:$16 sps:$4 sm:$0xff]   ;;  %v4277_v46 = vld [vmem:[%s5785_s1 + $0x524] ss:$16 sps:$4 sm:$0xff]  }
  0x9b   :  { %1590 = vmatprep.mubr.bf16.mxu0 %v166_v49 }
  0x9c   :  { %2033 = vmatmul.mubr.bf16.vlgmr.msra.gmra.mrb[32].mxu1 %v158_v39  ;;  %v4274_v39 = vld [vmem:[%s5785_s1 + $0x4ec] ss:$16 sps:$4 sm:$0xff]  }
  0x9d   :  { %1664 = vmatpush1.bf16.msra.mxu0 %v4227_v47  ;;  %2114 = vmatpush1.bf16.msra.mxu1 %v4230_v48  ;;  %v4280_v47 = vld [vmem:[%s5785_s1 + $0x50c] ss:$16 sps:$4 sm:$0xff]   ;;  %v194_v48 = vpack.c.bf16 %v124_v42, %v117_v41  ;;  %v70_v41 = vld [vmem:[%s5784_s0 + $0xd0] sm:$0xff] }
  0x9e   :  { %1665 = vmatprep.subr.bf16.mxu0 %v4235_v52  ;;  %2115 = vmatprep.subr.bf16.mxu1 %v4238_v53  ;;  %v123_v52 = vld [vmem:[%s5784_s0 + $0x278] sm:$0xff]  ;;  %v4283_v53 = vld [vmem:[%s5785_s1 + $0x544] ss:$16 sps:$4 sm:$0xff]  }
  0x9f   :  { %2042 = vmatprep.mubr.bf16.mxu1 %v166_v49  ;;  %v4275_v49 = vld [vmem:[%s5785_s1 + $0x520] ss:$16 sps:$4 sm:$0xff]   ;;  %v193_v58 = vpack.c.bf16 %v123_v52, %v116_v51  ;;  %v69_v52 = vld [vmem:[%s5784_s0 + $0xc8] sm:$0xff] }
  0xa0   :  { %1591 = vmatmul.mubr.bf16.gmra.mrb[4].mxu0 %v165_v56  ;;  %v62_v51 = vld [vmem:[%s5784_s0 + $0x90] sm:$0xff] }
  0xa1   :  { %1666 = vmatpush1.bf16.msra.mxu0 %v4233_v55  ;;  %2116 = vmatpush1.bf16.msra.mxu1 %v4236_v57  ;;  %v4286_v55 = vld [vmem:[%s5785_s1 + $0x52c] ss:$16 sps:$4 sm:$0xff]   ;;  %v4284_v57 = vld [vmem:[%s5785_s1 + $0x528] ss:$16 sps:$4 sm:$0xff]  }
  0xa2   :  { %1667 = vmatprep.subr.bf16.mxu0 %v4241_v60  ;;  %2117 = vmatprep.subr.bf16.mxu1 %v4244_v61  ;;  %v4292_v60 = vld [vmem:[%s5785_s1 + $0x54c] ss:$16 sps:$4 sm:$0xff]  }
  0xa3   :  { %1600 = vmatprep.mubr.bf16.mxu0 %v173_v63  ;;  %v131_v61 = vld [vmem:[%s5784_s0 + $0x2b8] sm:$0xff] }
  0xa4   :  { %2043 = vmatmul.mubr.bf16.gmra.mrb[36].mxu1 %v165_v56  ;;  %v4281_v56 = vld [vmem:[%s5785_s1 + $0x540] ss:$16 sps:$4 sm:$0xff]  }
  0xa5   :  { %1668 = vmatpush1.bf16.msra.mxu0 %v4239_v62  ;;  %2118 = vmatpush1.bf16.msra.mxu1 %v4242_v0  ;;  %v138_v62 = vld [vmem:[%s5784_s0 + $0x2f0] sm:$0xff]  ;;  %v4290_v0 = vld [vmem:[%s5785_s1 + $0x548] ss:$16 sps:$4 sm:$0xff]  }
  0xa6   :  { %1669 = vmatprep.subr.bf16.mxu0 %v4247_v5  ;;  %2119 = vmatprep.subr.bf16.mxu1 %v4250_v6  ;;  %v201_v3 = vpack.c.bf16 %v138_v62, %v131_v61  ;;  %v137_v5 = vld [vmem:[%s5784_s0 + $0x2e8] sm:$0xff]  ;;  %v4295_v6 = vld [vmem:[%s5785_s1 + $0x584] ss:$16 sps:$4 sm:$0xff]  }
  0xa7   :  { %2052 = vmatprep.mubr.bf16.mxu1 %v173_v63  ;;  %v4287_v63 = vld [vmem:[%s5785_s1 + $0x560] ss:$16 sps:$4 sm:$0xff]  }
  0xa8   :  { %1601 = vmatmul.mubr.bf16.gmra.mrb[8].mxu0 %v172_v10  ;;  %v4334_v61 = vld [vmem:[#allocation3 + $0x34] ss:$8 sps:$4 sm:$0xff]  }
  0xa9   :  { %1670 = vmatpush1.bf16.msra.mxu0 %v4245_v7  ;;  %2120 = vmatpush1.bf16.msra.mxu1 %v4248_v8  ;;  %v4298_v7 = vld [vmem:[%s5785_s1 + $0x56c] ss:$16 sps:$4 sm:$0xff]   ;;  %v76_v62 = vld [vmem:[%s5784_s0 + $0x100] sm:$0xff] }
  0xaa   :  { %1671 = vmatprep.subr.bf16.mxu0 %v4253_v13  ;;  %2121 = vmatprep.subr.bf16.mxu1 %v4256_v14  ;;  %v145_v8 = vld [vmem:[%s5784_s0 + $0x328] sm:$0xff]  ;;  %v200_v13 = vpack.c.bf16 %v137_v5, %v130_v4  ;;  %v4301_v14 = vld [vmem:[%s5785_s1 + $0x5a4] ss:$16 sps:$4 sm:$0xff]  }
  0xab   :  { %1610 = vmatprep.mubr.bf16.mxu0 %v180_v15  ;;  %v4332_v4 = vld [vmem:[#allocation3 + $0x30] ss:$8 sps:$4 sm:$0xff]   ;;  %v4337_v5 = vld [vmem:[#allocation3 + $0x44] ss:$8 sps:$4 sm:$0xff]  }
  0xac   :  { %2053 = vmatmul.mubr.bf16.gmra.mrb[40].mxu1 %v172_v10  ;;  %v152_v10 = vld [vmem:[%s5784_s0 + $0x360] sm:$0xff] }
  0xad   :  { %1672 = vmatpush1.bf16.msra.mxu0 %v4251_v16  ;;  %2122 = vmatpush1.bf16.msra.mxu1 %v4254_v18  ;;  %v4299_v16 = vld [vmem:[%s5785_s1 + $0x5a0] ss:$16 sps:$4 sm:$0xff]   ;;  %v4302_v18 = vld [vmem:[%s5785_s1 + $0x588] ss:$16 sps:$4 sm:$0xff]   ;;  %v208_v19 = vpack.c.bf16 %v152_v10, %v145_v8 }
  0xae   :  { %1673 = vmatprep.subr.bf16.mxu0 %v4259_v22  ;;  %2123 = vmatprep.subr.bf16.mxu1 %v4262_v23  ;;  %v151_v22 = vld [vmem:[%s5784_s0 + $0x358] sm:$0xff]  ;;  %v4307_v23 = vld [vmem:[%s5785_s1 + $0x5c4] ss:$16 sps:$4 sm:$0xff]  }
  0xaf   :  { %2062 = vmatprep.mubr.bf16.mxu1 %v180_v15  ;;  %v4304_v15 = vld [vmem:[%s5785_s1 + $0x58c] ss:$16 sps:$4 sm:$0xff]  }
  0xb0   :  { %1611 = vmatmul.mubr.bf16.gmra.mrb[12].mxu0 %v179_v26  ;;  %v4335_v8 = vld [vmem:[#allocation3 + $0x40] ss:$8 sps:$4 sm:$0xff]   ;;  %v4340_v10 = vld [vmem:[#allocation3 + $0x54] ss:$8 sps:$4 sm:$0xff]  }
  0xb1   :  { %1674 = vmatpush1.bf16.msra.mxu0 %v4257_v24  ;;  %2124 = vmatpush1.bf16.msra.mxu1 %v4260_v25  ;;  %v4310_v24 = vld [vmem:[%s5785_s1 + $0x5ac] ss:$16 sps:$4 sm:$0xff]  }
  0xb2   :  { %1675 = vmatprep.subr.bf16.mxu0 %v4265_v29  ;;  %2125 = vmatprep.subr.bf16.mxu1 %v4268_v31  ;;  %v49_v25 = vld [vmem:[%s5784_s0 + $0x28] sm:$0xff]  ;;  %v207_v29 = vpack.c.bf16 %v151_v22, %v144_v21  ;;  %v4313_v31 = vld [vmem:[%s5785_s1 + $0x5e4] ss:$16 sps:$4 sm:$0xff]  }
  0xb3   :  { %1620 = vmatprep.mubr.bf16.mxu0 %v187_v34  ;;  %v4341_v21 = vld [vmem:[#allocation3 + $0x60] ss:$8 sps:$4 sm:$0xff]  }
  0xb4   :  { %2063 = vmatmul.mubr.bf16.gmra.mrb[44].mxu1 %v179_v26  ;;  %v56_v26 = vld [vmem:[%s5784_s0 + $0x60] sm:$0xff] }
  0xb5   :  { %1676 = vmatpush1.bf16.msra.mxu0 %v4263_v33  ;;  %2126 = vmatpush1.bf16.msra.mxu1 %v4266_v35  ;;  %v4316_v33 = vld [vmem:[%s5785_s1 + $0x5cc] ss:$16 sps:$4 sm:$0xff]   ;;  %v4314_v35 = vld [vmem:[%s5785_s1 + $0x5c8] ss:$16 sps:$4 sm:$0xff]   ;;  %v161_v36 = vpack.c.bf16 %v56_v26, %v49_v25  ;;  %v104_v26 = vld [vmem:[%s5784_s0 + $0x1e0] sm:$0xff] }
  0xb6   :  { %1677 = vmatprep.subr.bf16.mxu0 %v4271_v38  ;;  %2127 = vmatprep.subr.bf16.mxu1 %v4274_v39  ;;  %v55_v38 = vld [vmem:[%s5784_s0 + $0x58] sm:$0xff] }
  0xb7   :  { %2072 = vmatprep.mubr.bf16.mxu1 %v187_v34  ;;  %v4311_v34 = vld [vmem:[%s5785_s1 + $0x5e0] ss:$16 sps:$4 sm:$0xff]   ;;  %v4319_v39 = vld [vmem:[%s5785_s1 + $0x5ec] ss:$16 sps:$4 sm:$0xff]   ;;  %v160_v42 = vpack.c.bf16 %v55_v38, %v48_v37 }
  0xb8   :  { %1621 = vmatmul.mubr.bf16.gmra.mrb[16].mxu0 %v186_v40  ;;  %v4347_v37 = vld [vmem:[#allocation3 + $0x80] ss:$8 sps:$4 sm:$0xff]  }
  0xb9   :  { %1678 = vmatpush1.bf16.msra.mxu0 %v4269_v44  ;;  %2128 = vmatpush1.bf16.msra.mxu1 %v4272_v45  ;;  %v4325_v44 = vld [vmem:[#allocation3 + $0x4] ss:$8 sps:$4 sm:$0xff]  }
  0xba   :  { %1679 = vmatprep.subr.bf16.mxu0 %v4277_v46  ;;  %2129 = vmatprep.subr.bf16.mxu1 %v4280_v47  ;;  %v4317_v45 = vld [vmem:[%s5785_s1 + $0x5e8] ss:$16 sps:$4 sm:$0xff]   ;;  %v4322_v47 = vld [vmem:[%s5785_s1 + $0x60c] ss:$16 sps:$4 sm:$0xff]  }
  0xbb   :  { %1630 = vmatprep.mubr.bf16.mxu0 %v194_v48 }
  0xbc   :  { %2073 = vmatmul.mubr.bf16.gmra.mrb[48].mxu1 %v186_v40  ;;  %v63_v40 = vld [vmem:[%s5784_s0 + $0x98] sm:$0xff] }
  0xbd   :  { %1680 = vmatpush1.bf16.msra.mxu0 %v4275_v49  ;;  %2130 = vmatpush1.bf16.msra.mxu1 %v4278_v50  ;;  %v168_v46 = vpack.c.bf16 %v70_v41, %v63_v40  ;;  %v4328_v49 = vld [vmem:[#allocation3 + $0x14] ss:$8 sps:$4 sm:$0xff]  }
  0xbe   :  { %1681 = vmatprep.subr.bf16.mxu0 %v4283_v53  ;;  %2131 = vmatprep.subr.bf16.mxu1 %v4286_v55  ;;  %v4320_v50 = vld [vmem:[%s5785_s1 + $0x608] ss:$16 sps:$4 sm:$0xff]   ;;  %v84_v55 = vld [vmem:[%s5784_s0 + $0x140] sm:$0xff] }
  0xbf   :  { %2082 = vmatprep.mubr.bf16.mxu1 %v194_v48  ;;  %v4323_v48 = vld [vmem:[#allocation3] ss:$8 sps:$4 sm:$0xff]  }
  0xc0   :  { %1631 = vmatmul.mubr.bf16.gmra.mrb[20].mxu0 %v193_v58  ;;  %v77_v53 = vld [vmem:[%s5784_s0 + $0x108] sm:$0xff] }
  0xc1   :  { %1682 = vmatpush1.bf16.msra.mxu0 %v4281_v56  ;;  %2132 = vmatpush1.bf16.msra.mxu1 %v4284_v57  ;;  %v4326_v56 = vld [vmem:[#allocation3 + $0x10] ss:$8 sps:$4 sm:$0xff]   ;;  %v4331_v57 = vld [vmem:[#allocation3 + $0x24] ss:$8 sps:$4 sm:$0xff]  }
  0xc2   :  { %1683 = vmatprep.subr.bf16.mxu0 %v4289_v59  ;;  %2133 = vmatprep.subr.bf16.mxu1 %v4292_v60  ;;  %v175_v59 = vpack.c.bf16 %v84_v55, %v77_v53  ;;  %v4329_v60 = vld [vmem:[#allocation3 + $0x20] ss:$8 sps:$4 sm:$0xff]   ;;  %v4358_v55 = vld [vmem:[#allocation3 + $0xb4] ss:$8 sps:$4 sm:$0xff]  }
  0xc3   :  { %1640 = vmatprep.mubr.bf16.mxu0 %v201_v3 }
  0xc4   :  { %2083 = vmatmul.mubr.bf16.gmra.mrb[52].mxu1 %v193_v58  ;;  %v167_v58 = vpack.c.bf16 %v69_v52, %v62_v51  ;;  %v4353_v52 = vld [vmem:[#allocation3 + $0xa0] ss:$8 sps:$4 sm:$0xff]  }
  0xc5   :  { %1684 = vmatpush1.bf16.msra.mxu0 %v4287_v63  ;;  %2134 = vmatpush1.bf16.msra.mxu1 %v4290_v0  ;;  %v83_v63 = vld [vmem:[%s5784_s0 + $0x138] sm:$0xff] }
  0xc6   :  { %1685 = vmatprep.subr.bf16.mxu0 %v4295_v6  ;;  %2135 = vmatprep.subr.bf16.mxu1 %v4298_v7  ;;  %v91_v0 = vld [vmem:[%s5784_s0 + $0x178] sm:$0xff]  ;;  %v174_v6 = vpack.c.bf16 %v83_v63, %v76_v62  ;;  %v154_v62 = vld [vmem:[%s5784_s0 + $0x370] sm:$0xff] }
  0xc7   :  { %2092 = vmatprep.mubr.bf16.mxu1 %v201_v3  ;;  %v98_v3 = vld [vmem:[%s5784_s0 + $0x1b0] sm:$0xff] }
  0xc8   :  { %1641 = vmatmul.mubr.bf16.gmra.mrb[24].mxu0 %v200_v13  ;;  %v182_v7 = vpack.c.bf16 %v98_v3, %v91_v0  ;;  %v4356_v63 = vld [vmem:[#allocation3 + $0xb0] ss:$8 sps:$4 sm:$0xff]   ;;  %v4361_v0 = vld [vmem:[#allocation3 + $0xc4] ss:$8 sps:$4 sm:$0xff]  }
  0xc9   :  { %1686 = vmatpush1.bf16.msra.mxu0 %v4293_v11  ;;  %2136 = vmatpush1.bf16.msra.mxu1 %v4296_v12  ;;  %v90_v11 = vld [vmem:[%s5784_s0 + $0x170] sm:$0xff]  ;;  %v97_v12 = vld [vmem:[%s5784_s0 + $0x1a8] sm:$0xff] }
  0xca   :  { %1687 = vmatprep.subr.bf16.mxu0 %v4301_v14  ;;  %2137 = vmatprep.subr.bf16.mxu1 %v4304_v15  ;;  %v112_v14 = vld [vmem:[%s5784_s0 + $0x220] sm:$0xff]  ;;  %v4338_v15 = vld [vmem:[#allocation3 + $0x50] ss:$8 sps:$4 sm:$0xff]  }
  0xcb   :  { %1650 = vmatprep.mubr.bf16.mxu0 %v208_v19 }
  0xcc   :  { %2093 = vmatmul.mubr.bf16.gmra.mrb[56].mxu1 %v200_v13  ;;  %v105_v13 = vld [vmem:[%s5784_s0 + $0x1e8] sm:$0xff] }
  0xcd   :  { %1688 = vmatpush1.bf16.msra.mxu0 %v4299_v16  ;;  %2138 = vmatpush1.bf16.msra.mxu1 %v4302_v18  ;;  %v4343_v16 = vld [vmem:[#allocation3 + $0x64] ss:$8 sps:$4 sm:$0xff]   ;;  %v181_v18 = vpack.c.bf16 %v97_v12, %v90_v11 }
  0xce   :  { %1689 = vmatprep.subr.bf16.mxu0 %v4307_v23  ;;  %2139 = vmatprep.subr.bf16.mxu1 %v4310_v24  ;;  %v4346_v23 = vld [vmem:[#allocation3 + $0x74] ss:$8 sps:$4 sm:$0xff]   ;;  %v153_v11 = vld [vmem:[%s5784_s0 + $0x368] sm:$0xff] }
  0xcf   :  { %2102 = vmatprep.mubr.bf16.mxu1 %v208_v19  ;;  %v189_v19 = vpack.c.bf16 %v112_v14, %v105_v13 }
  0xd0   :  { %1651 = vmatmul.mubr.bf16.gmra.mrb[28].mxu0 %v207_v29 }
  0xd1   :  { %1690 = vmatpush1.bf16.msra.mxu0 %v4305_v27  ;;  %2140 = vmatpush1.bf16.msra.mxu1 %v4308_v28  ;;  %v111_v27 = vld [vmem:[%s5784_s0 + $0x218] sm:$0xff] }
  0xd2   :  { %1691 = vmatprep.subr.bf16.mxu0 %v4313_v31  ;;  %2141 = vmatprep.subr.bf16.mxu1 %v4316_v33  ;;  %v126_v31 = vld [vmem:[%s5784_s0 + $0x290] sm:$0xff] }
  0xd3   :  { %1693 = vmatprep.mubr.bf16.mxu0 %v161_v36  ;;  %v4344_v33 = vld [vmem:[#allocation3 + $0x70] ss:$8 sps:$4 sm:$0xff]  }
  0xd4   :  { %2103 = vmatmul.mubr.bf16.gmra.mrb[60].mxu1 %v207_v29  ;;  %v119_v29 = vld [vmem:[%s5784_s0 + $0x258] sm:$0xff] }
  0xd5   :  { %1692 = vmatpush1.bf16.msra.mxu0 %v4311_v34  ;;  %2142 = vmatpush1.bf16.msra.mxu1 %v4314_v35  ;;  %v4349_v34 = vld [vmem:[#allocation3 + $0x84] ss:$8 sps:$4 sm:$0xff]   ;;  %v188_v35 = vpack.c.bf16 %v111_v27, %v104_v26 }
  0xd6   :  { %2143 = vmatprep.subr.bf16.mxu1 %v4319_v39  ;;  %2145 = vmatprep.mubr.bf16.mxu1 %v161_v36  ;;  %v196_v36 = vpack.c.bf16 %v126_v31, %v119_v29  ;;  %v4352_v39 = vld [vmem:[#allocation3 + $0x94] ss:$8 sps:$4 sm:$0xff]  }
  0xd7   :  { %2959 = vmatprep.subr.bf16.mxu0 %v4325_v44  ;;  %v125_v44 = vld [vmem:[%s5784_s0 + $0x288] sm:$0xff] }
  0xd8   :  { %1694 = vmatmul.mubr.bf16.vlgmr.msra.gmra.mrb[0].mxu0 %v160_v42 }
  0xd9   :  { %2144 = vmatpush1.bf16.msra.mxu1 %v4317_v45  ;;  %1703 = vmatprep.mubr.bf16.mxu0 %v168_v46 }
  0xda   :  { %2226 = vmatprep.subr.bf16.mxu1 %v4322_v47  ;;  %2960 = vmatpush1.bf16.msra.mxu0 %v4323_v48  ;;  %v140_v47 = vld [vmem:[%s5784_s0 + $0x300] sm:$0xff]  ;;  %v4350_v48 = vld [vmem:[#allocation3 + $0x90] ss:$8 sps:$4 sm:$0xff]  }
  0xdb   :  { %2961 = vmatprep.subr.bf16.mxu0 %v4328_v49  ;;  %v4355_v49 = vld [vmem:[#allocation3 + $0xa4] ss:$8 sps:$4 sm:$0xff]  }
  0xdc   :  { %2146 = vmatmul.mubr.bf16.vlgmr.msra.gmra.mrb[32].mxu1 %v160_v42  ;;  %v118_v42 = vld [vmem:[%s5784_s0 + $0x250] sm:$0xff] }
  0xdd   :  { %2227 = vmatpush1.bf16.msra.mxu1 %v4320_v50  ;;  %2155 = vmatprep.mubr.bf16.mxu1 %v168_v46  ;;  %v133_v46 = vld [vmem:[%s5784_s0 + $0x2c8] sm:$0xff]  ;;  %v195_v50 = vpack.c.bf16 %v125_v44, %v118_v42  ;;  %v4370_v44 = vld [vmem:[#allocation3 + $0xf4] ss:$8 sps:$4 sm:$0xff]  }
  0xde   :  { %2962 = vmatpush1.bf16.msra.mxu0 %v4326_v56  ;;  %v203_v51 = vpack.c.bf16 %v140_v47, %v133_v46  ;;  %v4365_v42 = vld [vmem:[#allocation3 + $0xe0] ss:$8 sps:$4 sm:$0xff]   ;;  %v4368_v46 = vld [vmem:[#allocation3 + $0xf0] ss:$8 sps:$4 sm:$0xff]   ;;  %v4373_v47 = vld [vmem:[#allocation3 + $0x104] ss:$8 sps:$4 sm:$0xff]  }
  0xdf   :  { %2963 = vmatprep.subr.bf16.mxu0 %v4331_v57 }
  0xe0   :  { %1704 = vmatmul.mubr.bf16.gmra.mrb[4].mxu0 %v167_v58 }
  0xe1   :  { %1713 = vmatprep.mubr.bf16.mxu0 %v175_v59 }
  0xe2   :  { %2964 = vmatpush1.bf16.msra.mxu0 %v4329_v60 }
  0xe3   :  { %2965 = vmatprep.subr.bf16.mxu0 %v4334_v61  ;;  %v147_v61 = vld [vmem:[%s5784_s0 + $0x338] sm:$0xff] }
  0xe4   :  { %2156 = vmatmul.mubr.bf16.gmra.mrb[36].mxu1 %v167_v58  ;;  %v132_v58 = vld [vmem:[%s5784_s0 + $0x2c0] sm:$0xff] }
  0xe5   :  { %2165 = vmatprep.mubr.bf16.mxu1 %v175_v59  ;;  %v139_v59 = vld [vmem:[%s5784_s0 + $0x2f8] sm:$0xff] }
  0xe6   :  { %2966 = vmatpush1.bf16.msra.mxu0 %v4332_v4  ;;  %v202_v3 = vpack.c.bf16 %v139_v59, %v132_v58  ;;  %v210_v4 = vpack.c.bf16 %v154_v62, %v147_v61 }
  0xe7   :  { %2967 = vmatprep.subr.bf16.mxu0 %v4337_v5  ;;  %v4359_v5 = vld [vmem:[#allocation3 + $0xc0] ss:$8 sps:$4 sm:$0xff]  }
  0xe8   :  { %1714 = vmatmul.mubr.bf16.gmra.mrb[8].mxu0 %v174_v6 }
  0xe9   :  { %1723 = vmatprep.mubr.bf16.mxu0 %v182_v7 }
  0xea   :  { %2968 = vmatpush1.bf16.msra.mxu0 %v4335_v8 }
  0xeb   :  { %2969 = vmatprep.subr.bf16.mxu0 %v4340_v10  ;;  %v146_v10 = vld [vmem:[%s5784_s0 + $0x330] sm:$0xff] }
  0xec   :  { %2166 = vmatmul.mubr.bf16.gmra.mrb[40].mxu1 %v174_v6  ;;  %v209_v13 = vpack.c.bf16 %v153_v11, %v146_v10 }
  0xed   :  { %2175 = vmatprep.mubr.bf16.mxu1 %v182_v7 }
  0xee   :  { %2970 = vmatpush1.bf16.msra.mxu0 %v4338_v15 }
  0xef   :  { %v5454_v22 = vpop.f32.mrb[0].mxu1  ;;  %2971 = vmatprep.subr.bf16.mxu0 %v4343_v16 }
  0xf0   :  { %1724 = vmatmul.mubr.bf16.gmra.mrb[12].mxu0 %v181_v18  ;;  %v5456_v24 = vpop.f32.mrb[1].mxu1 }
  0xf1   :  { %v5458_v25 = vpop.f32.mrb[2].mxu1  ;;  %1733 = vmatprep.mubr.bf16.mxu0 %v189_v19 }
  0xf2   :  { %v5466_v28 = vpop.f32.mrb[3].mxu1  ;;  %2972 = vmatpush1.bf16.msra.mxu0 %v4341_v21 }
  0xf3   :  { %2973 = vmatprep.subr.bf16.mxu0 %v4346_v23 }
  0xf4   :  { %2176 = vmatmul.mubr.bf16.gmra.mrb[44].mxu1 %v181_v18 }
  0xf5   :  { %2185 = vmatprep.mubr.bf16.mxu1 %v189_v19 }
  0xf6   :  { %2974 = vmatpush1.bf16.msra.mxu0 %v4344_v33 }
  0xf7   :  { %v5474_v38 = vpop.f32.mrb[4].mxu1  ;;  %2975 = vmatprep.subr.bf16.mxu0 %v4349_v34 }
  0xf8   :  { %1734 = vmatmul.mubr.bf16.gmra.mrb[16].mxu0 %v188_v35  ;;  %v5476_v40 = vpop.f32.mrb[5].mxu1 }
  0xf9   :  { %v5478_v41 = vpop.f32.mrb[6].mxu1  ;;  %1743 = vmatprep.mubr.bf16.mxu0 %v196_v36 }
  0xfa   :  { %v5486_v45 = vpop.f32.mrb[7].mxu1  ;;  %2976 = vmatpush1.bf16.msra.mxu0 %v4347_v37  ;;  %v4364_v37 = vld [vmem:[#allocation3 + $0xd4] ss:$8 sps:$4 sm:$0xff]  }
  0xfb   :  { %2977 = vmatprep.subr.bf16.mxu0 %v4352_v39  ;;  %v4362_v39 = vld [vmem:[#allocation3 + $0xd0] ss:$8 sps:$4 sm:$0xff]  }
  0xfc   :  { %2186 = vmatmul.mubr.bf16.gmra.mrb[48].mxu1 %v188_v35 }
  0xfd   :  { %2195 = vmatprep.mubr.bf16.mxu1 %v196_v36 }
  0xfe   :  { %2978 = vmatpush1.bf16.msra.mxu0 %v4350_v48 }
  0xff   :  { %v5494_v53 = vpop.f32.mrb[8].mxu1  ;;  %2979 = vmatprep.subr.bf16.mxu0 %v4355_v49 }
 0x100   :  { %1744 = vmatmul.mubr.bf16.gmra.mrb[20].mxu0 %v195_v50  ;;  %v5496_v56 = vpop.f32.mrb[9].mxu1 }
 0x101   :  { %v5498_v57 = vpop.f32.mrb[10].mxu1  ;;  %1753 = vmatprep.mubr.bf16.mxu0 %v203_v51 }
 0x102   :  { %v5506_v60 = vpop.f32.mrb[11].mxu1  ;;  %2980 = vmatpush1.bf16.msra.mxu0 %v4353_v52 }
 0x103   :  { %2981 = vmatprep.subr.bf16.mxu0 %v4358_v55 }
 0x104   :  { %2196 = vmatmul.mubr.bf16.gmra.mrb[52].mxu1 %v195_v50 }
 0x105   :  { %2205 = vmatprep.mubr.bf16.mxu1 %v203_v51 }
 0x106   :  { %2982 = vmatpush1.bf16.msra.mxu0 %v4356_v63 }
 0x107   :  { %v5514_v6 = vpop.f32.mrb[12].mxu1  ;;  %2983 = vmatprep.subr.bf16.mxu0 %v4361_v0 }
 0x108   :  { %1754 = vmatmul.mubr.bf16.gmra.mrb[24].mxu0 %v202_v3  ;;  %v5516_v7 = vpop.f32.mrb[13].mxu1 }
 0x109   :  { %v5518_v8 = vpop.f32.mrb[14].mxu1  ;;  %1763 = vmatprep.mubr.bf16.mxu0 %v210_v4 }
 0x10a   :  { %v5526_v12 = vpop.f32.mrb[15].mxu1  ;;  %2984 = vmatpush1.bf16.msra.mxu0 %v4359_v5 }
 0x10b   :  { %2985 = vmatprep.subr.bf16.mxu0 %v4364_v37 }
 0x10c   :  { %2206 = vmatmul.mubr.bf16.gmra.mrb[56].mxu1 %v202_v3 }
 0x10d   :  { %2215 = vmatprep.mubr.bf16.mxu1 %v210_v4 }
 0x10e   :  { %2986 = vmatpush1.bf16.msra.mxu0 %v4362_v39 }
 0x10f   :  { %v5528_v14 = vpop.f32.mrb[16].mxu1 }
 0x110   :  { %1764 = vmatmul.mubr.bf16.gmra.mrb[28].mxu0 %v209_v13  ;;  %v5530_v15 = vpop.f32.mrb[17].mxu1 }
 0x111   :  { %v5532_v16 = vpop.f32.mrb[18].mxu1 }
 0x112   :  { %v5534_v18 = vpop.f32.mrb[19].mxu1 }
 0x114   :  { %2216 = vmatmul.mubr.bf16.gmra.mrb[60].mxu1 %v209_v13 }
 0x115   :  { %2258 = vmatprep.mubr.bf16.mxu1 %v4474_v1 }
 0x117   :  { %v5537_v19 = vpop.f32.mrb[20].mxu1 }
 0x118   :  { %v5539_v21 = vpop.f32.mrb[21].mxu1 }
 0x119   :  { %v5541_v23 = vpop.f32.mrb[22].mxu1 }
 0x11a   :  { %v5543_v26 = vpop.f32.mrb[23].mxu1 }
 0x11c   :  { %3599 = vmatmul.mubr.msk.bf16.vlgmr.msra.gmra.mrb[32].mxu1 %vm1410_vm0, %v4554_v9 }
 0x11d   :  { %2268 = vmatprep.mubr.bf16.mxu1 %v4474_v1 }
 0x11f   :  { %v5548_v27 = vpop.f32.mrb[24].mxu1 }
 0x120   :  { %v5550_v29 = vpop.f32.mrb[25].mxu1 }
 0x121   :  { %v5552_v31 = vpop.f32.mrb[26].mxu1 }
 0x122   :  { %v5554_v33 = vpop.f32.mrb[27].mxu1 }
 0x124   :  { %3600 = vmatmul.mubr.msk.bf16.gmra.mrb[36].mxu1 %vm1410_vm0, %v4589_v20  ;;  %v4367_v20 = vld [vmem:[#allocation3 + $0xe4] ss:$8 sps:$4 sm:$0xff]  }
 0x125   :  { %2278 = vmatprep.mubr.bf16.mxu1 %v4474_v1  ;;  %2987 = vmatprep.subr.bf16.mxu0 %v4367_v20 }
 0x126   :  { %2988 = vmatpush1.bf16.msra.mxu0 %v4365_v42 }
 0x127   :  { %v5559_v34 = vpop.f32.mrb[28].mxu1  ;;  %2989 = vmatprep.subr.bf16.mxu0 %v4370_v44 }
 0x128   :  { %v5561_v35 = vpop.f32.mrb[29].mxu1 }
 0x129   :  { %v5563_v9 = vpop.f32.mrb[30].mxu1 }
 0x12a   :  { %v5565_v36 = vpop.f32.mrb[31].mxu1  ;;  %2990 = vmatpush1.bf16.msra.mxu0 %v4368_v46 }
 0x12b   :  { %3072 = vmatprep.subr.bf16.mxu0 %v4373_v47 }
 0x12c   :  { %3601 = vmatmul.mubr.msk.bf16.gmra.mrb[40].mxu1 %vm1410_vm0, %v4627_v32  ;;  %v410_v32 = vlaneseq }
 0x12d   :  { %2288 = vmatprep.mubr.bf16.mxu1 %v4474_v1 }
 0x134   :  { %3602 = vmatmul.mubr.msk.bf16.gmra.mrb[44].mxu1 %vm1410_vm0, %v4662_v43  ;;  %v5584_v43 = vshrl.u32 %v410_v32, 7 }
 0x135   :  { %2298 = vmatprep.mubr.bf16.mxu1 %v4474_v1 }
 0x136   :  { %v5595_v48 = vsub.s32 1, %v5584_v43 }
 0x13c   :  { %3603 = vmatmul.mubr.msk.bf16.gmra.mrb[48].mxu1 %vm1410_vm0, %v4697_v54  ;;  %v5587_v54 = vsub.s32 0, %v5584_v43 }
 0x13d   :  { %2308 = vmatprep.mubr.bf16.mxu1 %v4474_v1 }
 0x144   :  { %3604 = vmatmul.mubr.msk.bf16.gmra.mrb[52].mxu1 %vm1410_vm0, %v4732_v2  ;;  %v5592_v2 = vld [vmem:[%s5786_s2] sm:$0xf] }
 0x145   :  { %2318 = vmatprep.mubr.bf16.mxu1 %v4474_v1 }
 0x14c   :  { %3605 = vmatmul.mubr.msk.bf16.gmra.mrb[56].mxu1 %vm1410_vm0, %v4773_v17  ;;  %v5603_v17 = vrot.slane %v5592_v2, %v5595_v48 }
 0x14d   :  { %2328 = vmatprep.mubr.bf16.mxu1 %v4474_v1  ;;  %v5599_v1 = vrot.slane %v5592_v2, %v5587_v54 }
 0x154   :  { %3606 = vmatmul.mubr.msk.bf16.gmra.mrb[60].mxu1 %vm1410_vm0, %v4811_v30 }
 0x1ab   :  { %v1695_v30 = vpop.f32.mrb[0].mxu0 }
 0x1ac   :  { %v3703_v49 = vadd.f32 %v1695_v30, %v5599_v1  ;;  %v1697_v50 = vpop.f32.mrb[1].mxu0  ;;  %v4371_v30 = vld [vmem:[#allocation3 + $0x100] ss:$8 sps:$4 sm:$0xff]  }
 0x1ad   :  { %v3705_v51 = vadd.f32 %v1697_v50, %v5603_v17  ;;  %v1699_v52 = vpop.f32.mrb[2].mxu0 }
 0x1ae   :  { %v3704_v55 = vadd.f32 %v3703_v49, %v5454_v22  ;;  %v3707_v58 = vadd.f32 %v1699_v52, %v5599_v1  ;;  %v1701_v59 = vpop.f32.mrb[3].mxu0 }
 0x1af   :  { %v3706_v61 = vadd.f32 %v3705_v51, %v5456_v24  ;;  %v3709_v62 = vadd.f32 %v1701_v59, %v5603_v17  ;;  %v4376_v51 = vld [vmem:[#allocation3 + $0x114] ss:$8 sps:$4 sm:$0xff]  }
 0x1b0   :  { %v2403_v63 = vmul.f32 0.2, %v3704_v55  ;;  %v3708_v0 = vadd.f32 %v3707_v58, %v5458_v25  ;;  %vm2339_vm1 = vcmp.gt.f32.partialorder %v3704_v55, 0.0 }
 0x1b1   :  { %v2404_v3 = vmul.f32 0.2, %v3706_v61  ;;  %v3710_v4 = vadd.f32 %v3709_v62, %v5466_v28  ;;  %vm2340_vm2 = vcmp.gt.f32.partialorder %v3706_v61, 0.0 }
 0x1b2   :  { %vm2343_vm3 = vcmp.gt.f32.partialorder %v3708_v0, 0.0  ;;  %v2407_v5 = vmul.f32 0.2, %v3708_v0  ;;  %v2467_v11 = vsel %vm2339_vm1, %v3704_v55, %v2403_v63  ;;  %v4379_v63 = vld [vmem:[#allocation3 + $0x124] ss:$8 sps:$4 sm:$0xff]  }
 0x1b3   :  { %vm2344_vm4 = vcmp.gt.f32.partialorder %v3710_v4, 0.0  ;;  %v2408_v10 = vmul.f32 0.2, %v3710_v4  ;;  %v1705_v22 = vpop.f32.mrb[4].mxu0  ;;  %v2468_v25 = vsel %vm2340_vm2, %v3706_v61, %v2404_v3  ;;  %v4374_v61 = vld [vmem:[#allocation3 + $0x110] ss:$8 sps:$4 sm:$0xff]  }
 0x1b4   :  { %v2471_v13 = vsel %vm2343_vm3, %v3708_v0, %v2407_v5  ;;  %v3711_v37 = vadd.f32 %v1705_v22, %v5599_v1  ;;  %v1707_v24 = vpop.f32.mrb[5].mxu0 }
 0x1b5   :  { %v2531_v39 = vpack.c.bf16 %v2471_v13, %v2467_v11  ;;  %v3713_v20 = vadd.f32 %v1707_v24, %v5603_v17  ;;  %v1709_v42 = vpop.f32.mrb[6].mxu0  ;;  %v2472_v44 = vsel %vm2344_vm4, %v3710_v4, %v2408_v10 }
 0x1b6   :  { %v3712_v46 = vadd.f32 %v3711_v37, %v5474_v38  ;;  %v3715_v28 = vadd.f32 %v1709_v42, %v5599_v1  ;;  %v1711_v47 = vpop.f32.mrb[7].mxu0  ;;  %v2532_v32 = vpack.c.bf16 %v2472_v44, %v2468_v25  ;;  %v4382_v44 = vld [vmem:[#allocation3 + $0x134] ss:$8 sps:$4 sm:$0xff]  }
 0x1b7   :  { %v3714_v49 = vadd.f32 %v3713_v20, %v5476_v40  ;;  %v3717_v50 = vadd.f32 %v1711_v47, %v5603_v17  ;;  %v4377_v20 = vld [vmem:[#allocation3 + $0x120] ss:$8 sps:$4 sm:$0xff]  }
 0x1b8   :  { %v2411_v52 = vmul.f32 0.2, %v3712_v46  ;;  %v3716_v55 = vadd.f32 %v3715_v28, %v5478_v41  ;;  %2991 = vmatprep.mubr.bf16.mxu0 %v2532_v32  ;;  %vm2347_vm5 = vcmp.gt.f32.partialorder %v3712_v46, 0.0 }
 0x1b9   :  { %v2412_v58 = vmul.f32 0.2, %v3714_v49  ;;  %v3718_v59 = vadd.f32 %v3717_v50, %v5486_v45  ;;  %2992 = vmatmul.mubr.bf16.vlgmr.msra.gmra.mrb[32].mxu0 %v2531_v39  ;;  %vm2348_vm6 = vcmp.gt.f32.partialorder %v3714_v49, 0.0  ;;  %v4385_v50 = vld [vmem:[#allocation3 + $0x144] ss:$8 sps:$4 sm:$0xff]  }
 0x1ba   :  { %vm2351_vm7 = vcmp.gt.f32.partialorder %v3716_v55, 0.0  ;;  %v2415_v38 = vmul.f32 0.2, %v3716_v55  ;;  %3073 = vmatpush1.bf16.msra.mxu0 %v4371_v30  ;;  %v2475_v41 = vsel %vm2347_vm5, %v3712_v46, %v2411_v52  ;;  %v4380_v30 = vld [vmem:[#allocation3 + $0x130] ss:$8 sps:$4 sm:$0xff]  }
 0x1bb   :  { %vm2352_vm8 = vcmp.gt.f32.partialorder %v3718_v59, 0.0  ;;  %v2416_v62 = vmul.f32 0.2, %v3718_v59  ;;  %v1715_v40 = vpop.f32.mrb[8].mxu0  ;;  %3074 = vmatprep.subr.bf16.mxu0 %v4376_v51  ;;  %v2476_v10 = vsel %vm2348_vm6, %v3714_v49, %v2412_v58 }
 0x1bc   :  { %v3719_v0 = vadd.f32 %v1715_v40, %v5599_v1  ;;  %v1717_v3 = vpop.f32.mrb[9].mxu0  ;;  %v2479_v4 = vsel %vm2351_vm7, %v3716_v55, %v2415_v38 }
 0x1bd   :  { %v3721_v5 = vadd.f32 %v1717_v3, %v5603_v17  ;;  %v1719_v45 = vpop.f32.mrb[10].mxu0  ;;  %v2480_v22 = vsel %vm2352_vm8, %v3718_v59, %v2416_v62  ;;  %v2535_v11 = vpack.c.bf16 %v2479_v4, %v2475_v41  ;;  %v4383_v3 = vld [vmem:[#allocation3 + $0x140] ss:$8 sps:$4 sm:$0xff]  }
 0x1be   :  { %v3720_v13 = vadd.f32 %v3719_v0, %v5494_v53  ;;  %v3723_v37 = vadd.f32 %v1719_v45, %v5599_v1  ;;  %v1721_v24 = vpop.f32.mrb[11].mxu0  ;;  %v2536_v39 = vpack.c.bf16 %v2480_v22, %v2476_v10  ;;  %3075 = vmatpush1.bf16.msra.mxu0 %v4374_v61 }
 0x1bf   :  { %v3722_v42 = vadd.f32 %v3721_v5, %v5496_v56  ;;  %v3725_v25 = vadd.f32 %v1721_v24, %v5603_v17  ;;  %3076 = vmatprep.subr.bf16.mxu0 %v4379_v63  ;;  %v4388_v5 = vld [vmem:[#allocation3 + $0x154] ss:$8 sps:$4 sm:$0xff]   ;;  %v4391_v24 = vld [vmem:[#allocation3 + $0x164] ss:$8 sps:$4 sm:$0xff]  }
 0x1c0   :  { %v2419_v46 = vmul.f32 0.2, %v3720_v13  ;;  %v3724_v28 = vadd.f32 %v3723_v37, %v5498_v57  ;;  %3001 = vmatprep.mubr.bf16.mxu0 %v2536_v39  ;;  %vm2355_vm9 = vcmp.gt.f32.partialorder %v3720_v13, 0.0 }
 0x1c1   :  { %v2420_v47 = vmul.f32 0.2, %v3722_v42  ;;  %v3726_v53 = vadd.f32 %v3725_v25, %v5506_v60  ;;  %3002 = vmatmul.mubr.bf16.gmra.mrb[36].mxu0 %v2535_v11  ;;  %vm2356_vm10 = vcmp.gt.f32.partialorder %v3722_v42, 0.0 }
 0x1c2   :  { %vm2359_vm11 = vcmp.gt.f32.partialorder %v3724_v28, 0.0  ;;  %v2423_v32 = vmul.f32 0.2, %v3724_v28  ;;  %3077 = vmatpush1.bf16.msra.mxu0 %v4377_v20  ;;  %v2483_v57 = vsel %vm2355_vm9, %v3720_v13, %v2419_v46  ;;  %v4386_v13 = vld [vmem:[#allocation3 + $0x150] ss:$8 sps:$4 sm:$0xff]  }
 0x1c3   :  { %vm2360_vm12 = vcmp.gt.f32.partialorder %v3726_v53, 0.0  ;;  %v2424_v56 = vmul.f32 0.2, %v3726_v53  ;;  %v1725_v49 = vpop.f32.mrb[12].mxu0  ;;  %3078 = vmatprep.subr.bf16.mxu0 %v4382_v44  ;;  %v2484_v59 = vsel %vm2356_vm10, %v3722_v42, %v2420_v47 }
 0x1c4   :  { %v3727_v51 = vadd.f32 %v1725_v49, %v5599_v1  ;;  %v1727_v52 = vpop.f32.mrb[13].mxu0  ;;  %v2487_v55 = vsel %vm2359_vm11, %v3724_v28, %v2423_v32 }
 0x1c5   :  { %v3729_v58 = vadd.f32 %v1727_v52, %v5603_v17  ;;  %v1729_v60 = vpop.f32.mrb[14].mxu0  ;;  %v2488_v38 = vsel %vm2360_vm12, %v3726_v53, %v2424_v56  ;;  %v2539_v61 = vpack.c.bf16 %v2487_v55, %v2483_v57  ;;  %v4389_v56 = vld [vmem:[#allocation3 + $0x160] ss:$8 sps:$4 sm:$0xff]  }
 0x1c6   :  { %v3728_v62 = vadd.f32 %v3727_v51, %v5514_v6  ;;  %v3731_v40 = vadd.f32 %v1729_v60, %v5599_v1  ;;  %v1731_v63 = vpop.f32.mrb[15].mxu0  ;;  %v2540_v0 = vpack.c.bf16 %v2488_v38, %v2484_v59  ;;  %3079 = vmatpush1.bf16.msra.mxu0 %v4380_v30  ;;  %v4394_v51 = vld [vmem:[#allocation3 + $0x174] ss:$8 sps:$4 sm:$0xff]   ;;  %v4392_v60 = vld [vmem:[#allocation3 + $0x170] ss:$8 sps:$4 sm:$0xff]  }
 0x1c7   :  { %v3730_v41 = vadd.f32 %v3729_v58, %v5516_v7  ;;  %v3733_v4 = vadd.f32 %v1731_v63, %v5603_v17  ;;  %3080 = vmatprep.subr.bf16.mxu0 %v4385_v50  ;;  %v4397_v38 = vld [vmem:[#allocation3 + $0x184] ss:$8 sps:$4 sm:$0xff]  }
 0x1c8   :  { %v2427_v45 = vmul.f32 0.2, %v3728_v62  ;;  %v3732_v10 = vadd.f32 %v3731_v40, %v5518_v8  ;;  %3011 = vmatprep.mubr.bf16.mxu0 %v2540_v0  ;;  %vm2363_vm13 = vcmp.gt.f32.partialorder %v3728_v62, 0.0 }
 0x1c9   :  { %v2428_v22 = vmul.f32 0.2, %v3730_v41  ;;  %v3734_v6 = vadd.f32 %v3733_v4, %v5526_v12  ;;  %3012 = vmatmul.mubr.bf16.gmra.mrb[40].mxu0 %v2539_v61  ;;  %vm2364_vm14 = vcmp.gt.f32.partialorder %v3730_v41, 0.0 }
 0x1ca   :  { %vm2367_vm15 = vcmp.gt.f32.partialorder %v3732_v10, 0.0  ;;  %v2431_v11 = vmul.f32 0.2, %v3732_v10  ;;  %3081 = vmatpush1.bf16.msra.mxu0 %v4383_v3  ;;  %v2491_v8 = vsel %vm2363_vm13, %v3728_v62, %v2427_v45 }
 0x1cb   :  { %vm2368_vm0 = vcmp.gt.f32.partialorder %v3734_v6, 0.0  ;;  %v2432_v7 = vmul.f32 0.2, %v3734_v6  ;;  %v1735_v37 = vpop.f32.mrb[16].mxu0  ;;  %3082 = vmatprep.subr.bf16.mxu0 %v4388_v5  ;;  %v2492_v44 = vsel %vm2364_vm14, %v3730_v41, %v2428_v22  ;;  %v4395_v22 = vld [vmem:[#allocation3 + $0x180] ss:$8 sps:$4 sm:$0xff]  }
 0x1cc   :  { %v3735_v39 = vadd.f32 %v1735_v37, %v5599_v1  ;;  %v1737_v20 = vpop.f32.mrb[17].mxu0  ;;  %v2495_v42 = vsel %vm2367_vm15, %v3732_v10, %v2431_v11 }
 0x1cd   :  { %v3737_v25 = vadd.f32 %v1737_v20, %v5603_v17  ;;  %v1739_v12 = vpop.f32.mrb[18].mxu0  ;;  %v2496_v46 = vsel %vm2368_vm0, %v3734_v6, %v2432_v7  ;;  %v2543_v28 = vpack.c.bf16 %v2495_v42, %v2491_v8  ;;  %v4398_v20 = vld [vmem:[#allocation3 + $0x190] ss:$8 sps:$4 sm:$0xff]   ;;  %v4403_v42 = vld [vmem:[#allocation3 + $0x1a4] ss:$8 sps:$4 sm:$0xff]  }
 0x1ce   :  { %v3736_v47 = vadd.f32 %v3735_v39, %v5528_v14  ;;  %v3739_v53 = vadd.f32 %v1739_v12, %v5599_v1  ;;  %v1741_v32 = vpop.f32.mrb[19].mxu0  ;;  %v2544_v30 = vpack.c.bf16 %v2496_v46, %v2492_v44  ;;  %3083 = vmatpush1.bf16.msra.mxu0 %v4386_v13  ;;  %v4400_v13 = vld [vmem:[#allocation3 + $0x194] ss:$8 sps:$4 sm:$0xff]  }
 0x1cf   :  { %v3738_v49 = vadd.f32 %v3737_v25, %v5530_v15  ;;  %v3741_v50 = vadd.f32 %v1741_v32, %v5603_v17  ;;  %3084 = vmatprep.subr.bf16.mxu0 %v4391_v24 }
 0x1d0   :  { %v2435_v52 = vmul.f32 0.2, %v3736_v47  ;;  %v3740_v57 = vadd.f32 %v3739_v53, %v5532_v16  ;;  %3021 = vmatprep.mubr.bf16.mxu0 %v2544_v30  ;;  %vm2371_vm1 = vcmp.gt.f32.partialorder %v3736_v47, 0.0 }
 0x1d1   :  { %v2436_v55 = vmul.f32 0.2, %v3738_v49  ;;  %v3742_v14 = vadd.f32 %v3741_v50, %v5534_v18  ;;  %3022 = vmatmul.mubr.bf16.gmra.mrb[44].mxu0 %v2543_v28  ;;  %vm2372_vm2 = vcmp.gt.f32.partialorder %v3738_v49, 0.0  ;;  %v4401_v50 = vld [vmem:[#allocation3 + $0x1a0] ss:$8 sps:$4 sm:$0xff]  }
 0x1d2   :  { %vm2375_vm3 = vcmp.gt.f32.partialorder %v3740_v57, 0.0  ;;  %v2439_v58 = vmul.f32 0.2, %v3740_v57  ;;  %3085 = vmatpush1.bf16.msra.mxu0 %v4389_v56  ;;  %v2499_v16 = vsel %vm2371_vm1, %v3736_v47, %v2435_v52 }
 0x1d3   :  { %vm2376_vm4 = vcmp.gt.f32.partialorder %v3742_v14, 0.0  ;;  %v2440_v15 = vmul.f32 0.2, %v3742_v14  ;;  %v1745_v59 = vpop.f32.mrb[20].mxu0  ;;  %3086 = vmatprep.subr.bf16.mxu0 %v4394_v51  ;;  %v2500_v0 = vsel %vm2372_vm2, %v3738_v49, %v2436_v55 }
 0x1d4   :  { %v3743_v61 = vadd.f32 %v1745_v59, %v5599_v1  ;;  %v1747_v62 = vpop.f32.mrb[21].mxu0  ;;  %v2503_v40 = vsel %vm2375_vm3, %v3740_v57, %v2439_v58  ;;  %v4406_v57 = vld [vmem:[#allocation3 + $0x1b4] ss:$8 sps:$4 sm:$0xff]  }
 0x1d5   :  { %v3745_v63 = vadd.f32 %v1747_v62, %v5603_v17  ;;  %v1749_v18 = vpop.f32.mrb[22].mxu0  ;;  %v2504_v3 = vsel %vm2376_vm4, %v3742_v14, %v2440_v15  ;;  %v2547_v41 = vpack.c.bf16 %v2503_v40, %v2499_v16  ;;  %v4404_v15 = vld [vmem:[#allocation3 + $0x1b0] ss:$8 sps:$4 sm:$0xff]  }
 0x1d6   :  { %v3744_v4 = vadd.f32 %v3743_v61, %v5537_v19  ;;  %v3747_v5 = vadd.f32 %v1749_v18, %v5599_v1  ;;  %v1751_v45 = vpop.f32.mrb[23].mxu0  ;;  %v2548_v10 = vpack.c.bf16 %v2504_v3, %v2500_v0  ;;  %3087 = vmatpush1.bf16.msra.mxu0 %v4392_v60 }
 0x1d7   :  { %v3746_v6 = vadd.f32 %v3745_v63, %v5539_v21  ;;  %v3749_v11 = vadd.f32 %v1751_v45, %v5603_v17  ;;  %3088 = vmatprep.subr.bf16.mxu0 %v4397_v38  ;;  %v4409_v38 = vld [vmem:[#allocation3 + $0x1c4] ss:$8 sps:$4 sm:$0xff]   ;;  %v4407_v45 = vld [vmem:[#allocation3 + $0x1c0] ss:$8 sps:$4 sm:$0xff]  }
 0x1d8   :  { %v2443_v7 = vmul.f32 0.2, %v3744_v4  ;;  %v3748_v37 = vadd.f32 %v3747_v5, %v5541_v23  ;;  %3031 = vmatprep.mubr.bf16.mxu0 %v2548_v10  ;;  %vm2379_vm5 = vcmp.gt.f32.partialorder %v3744_v4, 0.0 }
 0x1d9   :  { %v2444_v24 = vmul.f32 0.2, %v3746_v6  ;;  %v3750_v19 = vadd.f32 %v3749_v11, %v5543_v26  ;;  %3032 = vmatmul.mubr.bf16.gmra.mrb[48].mxu0 %v2547_v41  ;;  %vm2380_vm6 = vcmp.gt.f32.partialorder %v3746_v6, 0.0 }
 0x1da   :  { %vm2383_vm7 = vcmp.gt.f32.partialorder %v3748_v37, 0.0  ;;  %v2447_v39 = vmul.f32 0.2, %v3748_v37  ;;  %3089 = vmatpush1.bf16.msra.mxu0 %v4395_v22  ;;  %v2507_v23 = vsel %vm2379_vm5, %v3744_v4, %v2443_v7  ;;  %v420_v7 = vsub.s32 2, %v5584_v43 }
 0x1db   :  { %vm2384_vm8 = vcmp.gt.f32.partialorder %v3750_v19, 0.0  ;;  %v2448_v21 = vmul.f32 0.2, %v3750_v19  ;;  %v1755_v8 = vpop.f32.mrb[24].mxu0  ;;  %3090 = vmatprep.subr.bf16.mxu0 %v4400_v13  ;;  %v2508_v28 = vsel %vm2380_vm6, %v3746_v6, %v2444_v24  ;;  %v4412_v6 = vld [vmem:[#allocation3 + $0x1d4] ss:$8 sps:$4 sm:$0xff]  }
 0x1dc   :  { %v3751_v25 = vadd.f32 %v1755_v8, %v5599_v1  ;;  %v1757_v12 = vpop.f32.mrb[25].mxu0  ;;  %v2511_v44 = vsel %vm2383_vm7, %v3748_v37, %v2447_v39  ;;  %v424_v37 = vsub.s32 3, %v5584_v43 }
 0x1dd   :  { %v3753_v46 = vadd.f32 %v1757_v12, %v5603_v17  ;;  %v1759_v26 = vpop.f32.mrb[26].mxu0  ;;  %v2512_v47 = vsel %vm2384_vm8, %v3750_v19, %v2448_v21  ;;  %v2551_v53 = vpack.c.bf16 %v2511_v44, %v2507_v23  ;;  %v4415_v19 = vld [vmem:[#allocation3 + $0x1e4] ss:$8 sps:$4 sm:$0xff]   ;;  %v4418_v23 = vld [vmem:[#allocation3 + $0x1f4] ss:$8 sps:$4 sm:$0xff]  }
 0x1de   :  { %v3752_v32 = vadd.f32 %v3751_v25, %v5548_v27  ;;  %v3755_v30 = vadd.f32 %v1759_v26, %v5599_v1  ;;  %v1761_v56 = vpop.f32.mrb[27].mxu0  ;;  %v2552_v49 = vpack.c.bf16 %v2512_v47, %v2508_v28  ;;  %3091 = vmatpush1.bf16.msra.mxu0 %v4398_v20  ;;  %v5687_v21 = vrot.slane %v5592_v2, %v424_v37  ;;  %v4413_v25 = vld [vmem:[#allocation3 + $0x1e0] ss:$8 sps:$4 sm:$0xff]  }
 0x1df   :  { %v3754_v51 = vadd.f32 %v3753_v46, %v5550_v29  ;;  %v3757_v52 = vadd.f32 %v1761_v56, %v5603_v17  ;;  %3092 = vmatprep.subr.bf16.mxu0 %v4403_v42 }
 0x1e0   :  { %v2451_v55 = vmul.f32 0.2, %v3752_v32  ;;  %v3756_v14 = vadd.f32 %v3755_v30, %v5552_v31  ;;  %3041 = vmatprep.mubr.bf16.mxu0 %v2552_v49  ;;  %vm2387_vm9 = vcmp.gt.f32.partialorder %v3752_v32, 0.0 }
 0x1e1   :  { %v2452_v58 = vmul.f32 0.2, %v3754_v51  ;;  %v3758_v27 = vadd.f32 %v3757_v52, %v5554_v33  ;;  %3042 = vmatmul.mubr.bf16.gmra.mrb[52].mxu0 %v2551_v53  ;;  %vm2388_vm10 = vcmp.gt.f32.partialorder %v3754_v51, 0.0 }
 0x1e2   :  { %vm2391_vm11 = vcmp.gt.f32.partialorder %v3756_v14, 0.0  ;;  %v2455_v60 = vmul.f32 0.2, %v3756_v14  ;;  %3093 = vmatpush1.bf16.msra.mxu0 %v4401_v50  ;;  %v2515_v31 = vsel %vm2387_vm9, %v3752_v32, %v2451_v55  ;;  %v4416_v32 = vld [vmem:[#allocation3 + $0x1f0] ss:$8 sps:$4 sm:$0xff]  }
 0x1e3   :  { %vm2392_vm12 = vcmp.gt.f32.partialorder %v3758_v27, 0.0  ;;  %v2456_v29 = vmul.f32 0.2, %v3758_v27  ;;  %v1765_v59 = vpop.f32.mrb[28].mxu0  ;;  %3094 = vmatprep.subr.bf16.mxu0 %v4406_v57  ;;  %v2516_v63 = vsel %vm2388_vm10, %v3754_v51, %v2452_v58 }
 0x1e4   :  { %v3759_v61 = vadd.f32 %v1765_v59, %v5599_v1  ;;  %v1767_v62 = vpop.f32.mrb[29].mxu0  ;;  %v2519_v16 = vsel %vm2391_vm11, %v3756_v14, %v2455_v60 }
 0x1e5   :  { %v3761_v40 = vadd.f32 %v1767_v62, %v5603_v17  ;;  %v1769_v33 = vpop.f32.mrb[30].mxu0  ;;  %v2520_v18 = vsel %vm2392_vm12, %v3758_v27, %v2456_v29  ;;  %v2555_v0 = vpack.c.bf16 %v2519_v16, %v2515_v31 }
 0x1e6   :  { %v3760_v3 = vadd.f32 %v3759_v61, %v5559_v34  ;;  %v3763_v41 = vadd.f32 %v1769_v33, %v5599_v1  ;;  %v1771_v4 = vpop.f32.mrb[31].mxu0  ;;  %v2556_v5 = vpack.c.bf16 %v2520_v18, %v2516_v63  ;;  %3095 = vmatpush1.bf16.msra.mxu0 %v4404_v15 }
 0x1e7   :  { %v3762_v10 = vadd.f32 %v3761_v40, %v5561_v35  ;;  %v3765_v22 = vadd.f32 %v1771_v4, %v5603_v17  ;;  %3096 = vmatprep.subr.bf16.mxu0 %v4409_v38  ;;  %v4410_v17 = vld [vmem:[#allocation3 + $0x1d0] ss:$8 sps:$4 sm:$0xff]  }
 0x1e8   :  { %v2459_v11 = vmul.f32 0.2, %v3760_v3  ;;  %v3764_v13 = vadd.f32 %v3763_v41, %v5563_v9  ;;  %3051 = vmatprep.mubr.bf16.mxu0 %v2556_v5  ;;  %vm2395_vm13 = vcmp.gt.f32.partialorder %v3760_v3, 0.0  ;;  %v5684_v9 = vrot.slane %v5592_v2, %v420_v7 }
 0x1e9   :  { %v2460_v34 = vmul.f32 0.2, %v3762_v10  ;;  %v3766_v1 = vadd.f32 %v3765_v22, %v5565_v36  ;;  %3052 = vmatmul.mubr.bf16.gmra.mrb[56].mxu0 %v2555_v0  ;;  %vm2396_vm14 = vcmp.gt.f32.partialorder %v3762_v10, 0.0 }
 0x1ea   :  { %vm2399_vm15 = vcmp.gt.f32.partialorder %v3764_v13, 0.0  ;;  %v2463_v35 = vmul.f32 0.2, %v3764_v13  ;;  %3097 = vmatpush1.bf16.msra.mxu0 %v4407_v45  ;;  %v2523_v39 = vsel %vm2395_vm13, %v3760_v3, %v2459_v11 }
 0x1eb   :  { %vm2400_vm0 = vcmp.gt.f32.partialorder %v3766_v1, 0.0  ;;  %v2464_v24 = vmul.f32 0.2, %v3766_v1  ;;  %3098 = vmatprep.subr.bf16.mxu0 %v4412_v6  ;;  %v2524_v36 = vsel %vm2396_vm14, %v3762_v10, %v2460_v34 }
 0x1ec   :  { %v2527_v20 = vsel %vm2399_vm15, %v3764_v13, %v2463_v35 }
 0x1ed   :  { %v2528_v8 = vsel %vm2400_vm0, %v3766_v1, %v2464_v24  ;;  %v2559_v43 = vpack.c.bf16 %v2527_v20, %v2523_v39 }
 0x1ee   :  { %v2560_v42 = vpack.c.bf16 %v2528_v8, %v2524_v36  ;;  %3099 = vmatpush1.bf16.msra.mxu0 %v4410_v17 }
 0x1ef   :  { %v2260_v12 = vpop.f32.mrb[32].mxu1  ;;  %3100 = vmatprep.subr.bf16.mxu0 %v4415_v19 }
 0x1f0   :  { %v3767_v44 = vadd.f32 %v2260_v12, %v5684_v9  ;;  %v2262_v46 = vpop.f32.mrb[33].mxu1  ;;  %3061 = vmatprep.mubr.bf16.mxu0 %v2560_v42 }
 0x1f1   :  { %v3768_v26 = vadd.f32 %v2262_v46, %v5687_v21  ;;  %v2264_v28 = vpop.f32.mrb[34].mxu1  ;;  %3062 = vmatmul.mubr.bf16.gmra.mrb[60].mxu0 %v2559_v43 }
 0x1f2   :  { %v2405_v47 = vmul.f32 0.2, %v3767_v44  ;;  %v3769_v2 = vadd.f32 %v2264_v28, %v5684_v9  ;;  %v2266_v53 = vpop.f32.mrb[35].mxu1  ;;  %3101 = vmatpush1.bf16.msra.mxu0 %v4413_v25  ;;  %vm2341_vm1 = vcmp.gt.f32.partialorder %v3767_v44, 0.0 }
 0x1f3   :  { %v2406_v30 = vmul.f32 0.2, %v3768_v26  ;;  %v3770_v56 = vadd.f32 %v2266_v53, %v5687_v21  ;;  %3102 = vmatprep.subr.bf16.mxu0 %v4418_v23  ;;  %vm2342_vm2 = vcmp.gt.f32.partialorder %v3768_v26, 0.0 }
 0x1f4   :  { %vm2345_vm3 = vcmp.gt.f32.partialorder %v3769_v2, 0.0  ;;  %v2409_v49 = vmul.f32 0.2, %v3769_v2  ;;  %v2469_v51 = vsel %vm2341_vm1, %v3767_v44, %v2405_v47 }
 0x1f5   :  { %vm2346_vm4 = vcmp.gt.f32.partialorder %v3770_v56, 0.0  ;;  %v2410_v50 = vmul.f32 0.2, %v3770_v56  ;;  %v2470_v14 = vsel %vm2342_vm2, %v3768_v26, %v2406_v30 }
 0x1f6   :  { %v2473_v52 = vsel %vm2345_vm3, %v3769_v2, %v2409_v49  ;;  %3103 = vmatpush1.bf16.msra.mxu0 %v4416_v32 }
 0x1f7   :  { %v2533_v57 = vpack.c.bf16 %v2473_v52, %v2469_v51  ;;  %v2270_v55 = vpop.f32.mrb[36].mxu1  ;;  %v2474_v58 = vsel %vm2346_vm4, %v3770_v56, %v2410_v50 }
 0x1f8   :  { %v3771_v27 = vadd.f32 %v2270_v55, %v5684_v9  ;;  %v2272_v60 = vpop.f32.mrb[37].mxu1  ;;  %v2534_v15 = vpack.c.bf16 %v2474_v58, %v2470_v14 }
 0x1f9   :  { %v3772_v29 = vadd.f32 %v2272_v60, %v5687_v21  ;;  %v2274_v59 = vpop.f32.mrb[38].mxu1 }
 0x1fa   :  { %v2413_v38 = vmul.f32 0.2, %v3771_v27  ;;  %v3773_v61 = vadd.f32 %v2274_v59, %v5684_v9  ;;  %v2276_v62 = vpop.f32.mrb[39].mxu1  ;;  %3104 = vmatprep.mubr.bf16.mxu0 %v2534_v15  ;;  %vm2349_vm5 = vcmp.gt.f32.partialorder %v3771_v27, 0.0 }
 0x1fb   :  { %v2414_v31 = vmul.f32 0.2, %v3772_v29  ;;  %v3774_v16 = vadd.f32 %v2276_v62, %v5687_v21  ;;  %3105 = vmatmul.mubr.bf16.vlgmr.msra.gmra.mrb[32].mxu0 %v2533_v57  ;;  %vm2350_vm6 = vcmp.gt.f32.partialorder %v3772_v29, 0.0 }
 0x1fc   :  { %vm2353_vm7 = vcmp.gt.f32.partialorder %v3773_v61, 0.0  ;;  %v2417_v40 = vmul.f32 0.2, %v3773_v61  ;;  %v2477_v63 = vsel %vm2349_vm5, %v3771_v27, %v2413_v38 }
 0x1fd   :  { %vm2354_vm8 = vcmp.gt.f32.partialorder %v3774_v16, 0.0  ;;  %v2418_v33 = vmul.f32 0.2, %v3774_v16  ;;  %v2478_v3 = vsel %vm2350_vm6, %v3772_v29, %v2414_v31 }
 0x1fe   :  { %v2481_v18 = vsel %vm2353_vm7, %v3773_v61, %v2417_v40 }
 0x1ff   :  { %v2280_v0 = vpop.f32.mrb[40].mxu1  ;;  %v2482_v41 = vsel %vm2354_vm8, %v3774_v16, %v2418_v33  ;;  %v2537_v4 = vpack.c.bf16 %v2481_v18, %v2477_v63 }
 0x200   :  { %v3775_v5 = vadd.f32 %v2280_v0, %v5684_v9  ;;  %v2282_v45 = vpop.f32.mrb[41].mxu1  ;;  %v2538_v10 = vpack.c.bf16 %v2482_v41, %v2478_v3 }
 0x201   :  { %v3776_v22 = vadd.f32 %v2282_v45, %v5687_v21  ;;  %v2284_v6 = vpop.f32.mrb[42].mxu1 }
 0x202   :  { %v2421_v11 = vmul.f32 0.2, %v3775_v5  ;;  %v3777_v13 = vadd.f32 %v2284_v6, %v5684_v9  ;;  %v2286_v7 = vpop.f32.mrb[43].mxu1  ;;  %3114 = vmatprep.mubr.bf16.mxu0 %v2538_v10  ;;  %vm2357_vm9 = vcmp.gt.f32.partialorder %v3775_v5, 0.0 }
 0x203   :  { %v2422_v34 = vmul.f32 0.2, %v3776_v22  ;;  %v3778_v1 = vadd.f32 %v2286_v7, %v5687_v21  ;;  %3115 = vmatmul.mubr.bf16.gmra.mrb[36].mxu0 %v2537_v4  ;;  %vm2358_vm10 = vcmp.gt.f32.partialorder %v3776_v22, 0.0 }
 0x204   :  { %vm2361_vm11 = vcmp.gt.f32.partialorder %v3777_v13, 0.0  ;;  %v2425_v37 = vmul.f32 0.2, %v3777_v13  ;;  %v2485_v17 = vsel %vm2357_vm9, %v3775_v5, %v2421_v11 }
 0x205   :  { %vm2362_vm12 = vcmp.gt.f32.partialorder %v3778_v1, 0.0  ;;  %v2426_v35 = vmul.f32 0.2, %v3778_v1  ;;  %v2486_v39 = vsel %vm2358_vm10, %v3776_v22, %v2422_v34 }
 0x206   :  { %v2489_v24 = vsel %vm2361_vm11, %v3777_v13, %v2425_v37 }
 0x207   :  { %v2290_v19 = vpop.f32.mrb[44].mxu1  ;;  %v2490_v20 = vsel %vm2362_vm12, %v3778_v1, %v2426_v35  ;;  %v2541_v36 = vpack.c.bf16 %v2489_v24, %v2485_v17 }
 0x208   :  { %v3779_v8 = vadd.f32 %v2290_v19, %v5684_v9  ;;  %v2292_v43 = vpop.f32.mrb[45].mxu1  ;;  %v2542_v42 = vpack.c.bf16 %v2490_v20, %v2486_v39 }
 0x209   :  { %v3780_v25 = vadd.f32 %v2292_v43, %v5687_v21  ;;  %v2294_v12 = vpop.f32.mrb[46].mxu1 }
 0x20a   :  { %v2429_v23 = vmul.f32 0.2, %v3779_v8  ;;  %v3781_v44 = vadd.f32 %v2294_v12, %v5684_v9  ;;  %v2296_v46 = vpop.f32.mrb[47].mxu1  ;;  %3124 = vmatprep.mubr.bf16.mxu0 %v2542_v42  ;;  %vm2365_vm13 = vcmp.gt.f32.partialorder %v3779_v8, 0.0 }
 0x20b   :  { %v2430_v26 = vmul.f32 0.2, %v3780_v25  ;;  %v3782_v28 = vadd.f32 %v2296_v46, %v5687_v21  ;;  %3125 = vmatmul.mubr.bf16.gmra.mrb[40].mxu0 %v2541_v36  ;;  %vm2366_vm14 = vcmp.gt.f32.partialorder %v3780_v25, 0.0 }
 0x20c   :  { %vm2369_vm15 = vcmp.gt.f32.partialorder %v3781_v44, 0.0  ;;  %v2433_v47 = vmul.f32 0.2, %v3781_v44  ;;  %v2493_v53 = vsel %vm2365_vm13, %v3779_v8, %v2429_v23 }
 0x20d   :  { %vm2370_vm0 = vcmp.gt.f32.partialorder %v3782_v28, 0.0  ;;  %v2434_v2 = vmul.f32 0.2, %v3782_v28  ;;  %v2494_v56 = vsel %vm2366_vm14, %v3780_v25, %v2430_v26 }
 0x20e   :  { %v2497_v32 = vsel %vm2369_vm15, %v3781_v44, %v2433_v47 }
 0x20f   :  { %v2300_v30 = vpop.f32.mrb[48].mxu1  ;;  %v2498_v49 = vsel %vm2370_vm0, %v3782_v28, %v2434_v2  ;;  %v2545_v50 = vpack.c.bf16 %v2497_v32, %v2493_v53 }
 0x210   :  { %v3783_v51 = vadd.f32 %v2300_v30, %v5684_v9  ;;  %v2302_v52 = vpop.f32.mrb[49].mxu1  ;;  %v2546_v57 = vpack.c.bf16 %v2498_v49, %v2494_v56 }
 0x211   :  { %v3784_v55 = vadd.f32 %v2302_v52, %v5687_v21  ;;  %v2304_v14 = vpop.f32.mrb[50].mxu1 }
 0x212   :  { %v2437_v58 = vmul.f32 0.2, %v3783_v51  ;;  %v3785_v27 = vadd.f32 %v2304_v14, %v5684_v9  ;;  %v2306_v60 = vpop.f32.mrb[51].mxu1  ;;  %3134 = vmatprep.mubr.bf16.mxu0 %v2546_v57  ;;  %vm2373_vm1 = vcmp.gt.f32.partialorder %v3783_v51, 0.0 }
 0x213   :  { %v2438_v15 = vmul.f32 0.2, %v3784_v55  ;;  %v3786_v29 = vadd.f32 %v2306_v60, %v5687_v21  ;;  %3135 = vmatmul.mubr.bf16.gmra.mrb[44].mxu0 %v2545_v50  ;;  %vm2374_vm2 = vcmp.gt.f32.partialorder %v3784_v55, 0.0 }
 0x214   :  { %vm2377_vm3 = vcmp.gt.f32.partialorder %v3785_v27, 0.0  ;;  %v2441_v59 = vmul.f32 0.2, %v3785_v27  ;;  %v2501_v61 = vsel %vm2373_vm1, %v3783_v51, %v2437_v58 }
 0x215   :  { %vm2378_vm4 = vcmp.gt.f32.partialorder %v3786_v29, 0.0  ;;  %v2442_v38 = vmul.f32 0.2, %v3786_v29  ;;  %v2502_v16 = vsel %vm2374_vm2, %v3784_v55, %v2438_v15 }
 0x216   :  { %v2505_v62 = vsel %vm2377_vm3, %v3785_v27, %v2441_v59 }
 0x217   :  { %v2310_v31 = vpop.f32.mrb[52].mxu1  ;;  %v2506_v40 = vsel %vm2378_vm4, %v3786_v29, %v2442_v38  ;;  %v2549_v33 = vpack.c.bf16 %v2505_v62, %v2501_v61  ;;  %v3282_v61 = vld [vmem:[#allocation2] sm:$0x1] }
 0x218   :  { %v3787_v63 = vadd.f32 %v2310_v31, %v5684_v9  ;;  %v2312_v18 = vpop.f32.mrb[53].mxu1  ;;  %v2550_v0 = vpack.c.bf16 %v2506_v40, %v2502_v16  ;;  %3285 = vperm.xlu0 %4028, %v3282_v61   ;;  %v2627_v62 = vld [vmem:[%s5788_s4] sm:$0x3]  ;;  %s4475_s4 = smov [#allocation6]  }
 0x219   :  { %v3788_v3 = vadd.f32 %v2312_v18, %v5687_v21  ;;  %v2314_v41 = vpop.f32.mrb[54].mxu1  ;;  %v5732_v31 = vrot.slane %v2627_v62, %v5587_v54  ;;  %v5735_v16 = vrot.slane %v2627_v62, %v5595_v48 }
 0x21a   :  { %v2445_v4 = vmul.f32 0.2, %v3787_v63  ;;  %v3789_v5 = vadd.f32 %v2314_v41, %v5684_v9  ;;  %v2316_v45 = vpop.f32.mrb[55].mxu1  ;;  %3144 = vmatprep.mubr.bf16.mxu0 %v2550_v0  ;;  %vm2381_vm5 = vcmp.gt.f32.partialorder %v3787_v63, 0.0 }
 0x21b   :  { %v2446_v10 = vmul.f32 0.2, %v3788_v3  ;;  %v3790_v22 = vadd.f32 %v2316_v45, %v5687_v21  ;;  %3145 = vmatmul.mubr.bf16.gmra.mrb[48].mxu0 %v2549_v33  ;;  %vm2382_vm6 = vcmp.gt.f32.partialorder %v3788_v3, 0.0 }
 0x21c   :  { %vm2385_vm7 = vcmp.gt.f32.partialorder %v3789_v5, 0.0  ;;  %v2449_v6 = vmul.f32 0.2, %v3789_v5  ;;  %v2509_v13 = vsel %vm2381_vm5, %v3787_v63, %v2445_v4 }
 0x21d   :  { %vm2386_vm8 = vcmp.gt.f32.partialorder %v3790_v22, 0.0  ;;  %v2450_v11 = vmul.f32 0.2, %v3790_v22  ;;  %v2510_v1 = vsel %vm2382_vm6, %v3788_v3, %v2446_v10 }
 0x21e   :  { %v2513_v7 = vsel %vm2385_vm7, %v3789_v5, %v2449_v6 }
 0x21f   :  { %v2320_v34 = vpop.f32.mrb[56].mxu1  ;;  %v2514_v37 = vsel %vm2386_vm8, %v3790_v22, %v2450_v11  ;;  %v2553_v35 = vpack.c.bf16 %v2513_v7, %v2509_v13 }
 0x220   :  { %v3791_v17 = vadd.f32 %v2320_v34, %v5684_v9  ;;  %v2322_v24 = vpop.f32.mrb[57].mxu1  ;;  %v2554_v19 = vpack.c.bf16 %v2514_v37, %v2510_v1 }
 0x221   :  { %v3792_v39 = vadd.f32 %v2322_v24, %v5687_v21  ;;  %v2324_v20 = vpop.f32.mrb[58].mxu1 }
 0x222   :  { %v2453_v36 = vmul.f32 0.2, %v3791_v17  ;;  %v3793_v8 = vadd.f32 %v2324_v20, %v5684_v9  ;;  %v2326_v43 = vpop.f32.mrb[59].mxu1  ;;  %3154 = vmatprep.mubr.bf16.mxu0 %v2554_v19  ;;  %vm2389_vm9 = vcmp.gt.f32.partialorder %v3791_v17, 0.0 }
 0x223   :  { %v2454_v42 = vmul.f32 0.2, %v3792_v39  ;;  %v3794_v25 = vadd.f32 %v2326_v43, %v5687_v21  ;;  %3155 = vmatmul.mubr.bf16.gmra.mrb[52].mxu0 %v2553_v35  ;;  %vm2390_vm10 = vcmp.gt.f32.partialorder %v3792_v39, 0.0 }
 0x224   :  { %vm2393_vm11 = vcmp.gt.f32.partialorder %v3793_v8, 0.0  ;;  %v2457_v12 = vmul.f32 0.2, %v3793_v8  ;;  %v2517_v44 = vsel %vm2389_vm9, %v3791_v17, %v2453_v36 }
 0x225   :  { %vm2394_vm12 = vcmp.gt.f32.partialorder %v3794_v25, 0.0  ;;  %v2458_v23 = vmul.f32 0.2, %v3794_v25  ;;  %v2518_v28 = vsel %vm2390_vm10, %v3792_v39, %v2454_v42 }
 0x226   :  { %v2521_v46 = vsel %vm2393_vm11, %v3793_v8, %v2457_v12 }
 0x227   :  { %v2330_v26 = vpop.f32.mrb[60].mxu1  ;;  %v2522_v47 = vsel %vm2394_vm12, %v3794_v25, %v2458_v23  ;;  %v2557_v2 = vpack.c.bf16 %v2521_v46, %v2517_v44 }
 0x228   :  { %v3795_v53 = vadd.f32 %v2330_v26, %v5684_v9  ;;  %v2332_v32 = vpop.f32.mrb[61].mxu1  ;;  %v2558_v30 = vpack.c.bf16 %v2522_v47, %v2518_v28 }
 0x229   :  { %v3796_v56 = vadd.f32 %v2332_v32, %v5687_v21  ;;  %v2334_v49 = vpop.f32.mrb[62].mxu1 }
 0x22a   :  { %v2461_v50 = vmul.f32 0.2, %v3795_v53  ;;  %v3797_v51 = vadd.f32 %v2334_v49, %v5684_v9  ;;  %v2336_v52 = vpop.f32.mrb[63].mxu1  ;;  %3164 = vmatprep.mubr.bf16.mxu0 %v2558_v30  ;;  %vm2397_vm13 = vcmp.gt.f32.partialorder %v3795_v53, 0.0  ;;  %v5724_v9 = vld [vmem:[%s5789_s5] sm:$0x3] }
 0x22b   :  { %v2462_v57 = vmul.f32 0.2, %v3796_v56  ;;  %v3798_v55 = vadd.f32 %v2336_v52, %v5687_v21  ;;  %3165 = vmatmul.mubr.bf16.gmra.mrb[56].mxu0 %v2557_v2  ;;  %vm2398_vm14 = vcmp.gt.f32.partialorder %v3796_v56, 0.0  ;;  %v3300_v21 = vrot.slane %v5724_v9, %v5595_v48  ;;  %s3386_s5 = sshll.u32 %s4475_s4, 4  ;;  %s3387_s5 = int_to_ptr.vmem [resolvable:$true] %s3386_s5 }
 0x22c   :  { %vm2401_vm15 = vcmp.gt.f32.partialorder %v3797_v51, 0.0  ;;  %v2465_v14 = vmul.f32 0.2, %v3797_v51  ;;  %v2525_v27 = vsel %vm2397_vm13, %v3795_v53, %v2461_v50  ;;  %s4445_s10 = scalar_lea.vmem %s3387_s5, 16  ;;  %s4449_s11 = scalar_lea.vmem %s3387_s5, 32 }
 0x22d   :  { %vm2402_vm0 = vcmp.gt.f32.partialorder %v3798_v55, 0.0  ;;  %v2466_v58 = vmul.f32 0.2, %v3798_v55  ;;  %v2526_v15 = vsel %vm2398_vm14, %v3796_v56, %v2462_v57  ;;  %3367 = vmatprep.mubr.f32.mxu1 %v3300_v21  ;;  %p4446_p8 = scmp.ne.s32.totalorder %s3387_s5, %s4445_s10  ;;  %p4450_p9 = scmp.lt.s32.totalorder %s3387_s5, %s3387_s5 }
 0x22e   :  { %v2529_v60 = vsel %vm2401_vm15, %v3797_v51, %v2465_v14  ;;  %p4451_p10 = scmp.lt.s32.totalorder %s4449_s11, %s4445_s10 }
 0x22f   :  { %v2530_v29 = vsel %vm2402_vm0, %v3798_v55, %v2466_v58  ;;  %v2561_v59 = vpack.c.bf16 %v2529_v60, %v2525_v27 }
 0x230   :  { %v2562_v38 = vpack.c.bf16 %v2530_v29, %v2526_v15  ;;  %p4452_p11 = por %p4451_p10, %p4450_p9 }
 0x232   :  { %3174 = vmatprep.mubr.bf16.mxu0 %v2562_v38  ;;  %p4453_p12 = pnand %p4452_p11, %p4446_p8 }
 0x233   :  { %3175 = vmatmul.mubr.bf16.gmra.mrb[60].mxu0 %v2561_v59 }
 0x2ce   :  { %v3106_v40 = vpop.f32.mrb[32].mxu0 }
 0x2cf   :  { %v3799_v33 = vadd.f32 %v3106_v40, %v5732_v31  ;;  %v3108_v63 = vpop.f32.mrb[33].mxu0 }
 0x2d0   :  { %v3800_v18 = vadd.f32 %v3108_v63, %v5735_v16  ;;  %v3110_v0 = vpop.f32.mrb[34].mxu0 }
 0x2d1   :  { %v3217_v3 = vmul.f32 0.2, %v3799_v33  ;;  %v3801_v41 = vadd.f32 %v3110_v0, %v5732_v31  ;;  %v3112_v4 = vpop.f32.mrb[35].mxu0  ;;  %vm3185_vm1 = vcmp.gt.f32.partialorder %v3799_v33, 0.0 }
 0x2d2   :  { %v3218_v5 = vmul.f32 0.2, %v3800_v18  ;;  %v3802_v45 = vadd.f32 %v3112_v4, %v5735_v16  ;;  %vm3186_vm2 = vcmp.gt.f32.partialorder %v3800_v18, 0.0 }
 0x2d3   :  { %vm3187_vm3 = vcmp.gt.f32.partialorder %v3801_v41, 0.0  ;;  %v3219_v10 = vmul.f32 0.2, %v3801_v41  ;;  %v3249_v22 = vsel %vm3185_vm1, %v3799_v33, %v3217_v3 }
 0x2d4   :  { %vm3188_vm4 = vcmp.gt.f32.partialorder %v3802_v45, 0.0  ;;  %v3220_v48 = vmul.f32 0.2, %v3802_v45  ;;  %v3250_v7 = vsel %vm3186_vm2, %v3800_v18, %v3218_v5 }
 0x2d5   :  { %v3251_v6 = vsel %vm3187_vm3, %v3801_v41, %v3219_v10 }
 0x2d6   :  { %v3673_v11 = vpack.c.bf16 %v3251_v6, %v3249_v22  ;;  %v3116_v13 = vpop.f32.mrb[36].mxu0  ;;  %v3252_v34 = vsel %vm3188_vm4, %v3802_v45, %v3220_v48 }
 0x2d7   :  { %v3803_v1 = vadd.f32 %v3116_v13, %v5732_v31  ;;  %v3118_v37 = vpop.f32.mrb[37].mxu0  ;;  %v3671_v35 = vpack.c.bf16 %v3252_v34, %v3250_v7 }
 0x2d8   :  { %v3804_v17 = vadd.f32 %v3118_v37, %v5735_v16  ;;  %v3120_v24 = vpop.f32.mrb[38].mxu0 }
 0x2d9   :  { %v3221_v19 = vmul.f32 0.2, %v3803_v1  ;;  %v3805_v39 = vadd.f32 %v3120_v24, %v5732_v31  ;;  %v3122_v20 = vpop.f32.mrb[39].mxu0  ;;  %3672 = vmatprep.subr.bf16.mxu1 %v3671_v35  ;;  %vm3189_vm5 = vcmp.gt.f32.partialorder %v3803_v1, 0.0 }
 0x2da   :  { %v3222_v36 = vmul.f32 0.2, %v3804_v17  ;;  %v3806_v8 = vadd.f32 %v3122_v20, %v5735_v16  ;;  %3674 = vmatpush1.bf16.xpose.msra.mxu1 %v3673_v11  ;;  %vm3190_vm6 = vcmp.gt.f32.partialorder %v3804_v17, 0.0 }
 0x2db   :  { %vm3191_vm7 = vcmp.gt.f32.partialorder %v3805_v39, 0.0  ;;  %v3223_v43 = vmul.f32 0.2, %v3805_v39  ;;  %v3253_v25 = vsel %vm3189_vm5, %v3803_v1, %v3221_v19 }
 0x2dc   :  { %vm3192_vm8 = vcmp.gt.f32.partialorder %v3806_v8, 0.0  ;;  %v3224_v42 = vmul.f32 0.2, %v3806_v8  ;;  %v3254_v46 = vsel %vm3190_vm6, %v3804_v17, %v3222_v36 }
 0x2dd   :  { %v3255_v12 = vsel %vm3191_vm7, %v3805_v39, %v3223_v43 }
 0x2de   :  { %v3677_v23 = vpack.c.bf16 %v3255_v12, %v3253_v25  ;;  %v3126_v44 = vpop.f32.mrb[40].mxu0  ;;  %v3256_v26 = vsel %vm3192_vm8, %v3806_v8, %v3224_v42 }
 0x2df   :  { %v3807_v28 = vadd.f32 %v3126_v44, %v5732_v31  ;;  %v3128_v47 = vpop.f32.mrb[41].mxu0  ;;  %v3675_v2 = vpack.c.bf16 %v3256_v26, %v3254_v46 }
 0x2e0   :  { %v3808_v53 = vadd.f32 %v3128_v47, %v5735_v16  ;;  %v3130_v32 = vpop.f32.mrb[42].mxu0 }
 0x2e1   :  { %v3225_v30 = vmul.f32 0.2, %v3807_v28  ;;  %v3809_v56 = vadd.f32 %v3130_v32, %v5732_v31  ;;  %v3132_v49 = vpop.f32.mrb[43].mxu0  ;;  %3676 = vmatprep.subr.bf16.mxu1 %v3675_v2  ;;  %vm3193_vm9 = vcmp.gt.f32.partialorder %v3807_v28, 0.0 }
 0x2e2   :  { %v3226_v50 = vmul.f32 0.2, %v3808_v53  ;;  %v3810_v51 = vadd.f32 %v3132_v49, %v5735_v16  ;;  %3678 = vmatpush1.bf16.xpose.msra.mxu1 %v3677_v23  ;;  %vm3194_vm10 = vcmp.gt.f32.partialorder %v3808_v53, 0.0 }
 0x2e3   :  { %vm3195_vm11 = vcmp.gt.f32.partialorder %v3809_v56, 0.0  ;;  %v3227_v52 = vmul.f32 0.2, %v3809_v56  ;;  %v3257_v55 = vsel %vm3193_vm9, %v3807_v28, %v3225_v30 }
 0x2e4   :  { %vm3196_vm12 = vcmp.gt.f32.partialorder %v3810_v51, 0.0  ;;  %v3228_v57 = vmul.f32 0.2, %v3810_v51  ;;  %v3258_v60 = vsel %vm3194_vm10, %v3808_v53, %v3226_v50 }
 0x2e5   :  { %v3259_v14 = vsel %vm3195_vm11, %v3809_v56, %v3227_v52 }
 0x2e6   :  { %v3681_v58 = vpack.c.bf16 %v3259_v14, %v3257_v55  ;;  %v3136_v27 = vpop.f32.mrb[44].mxu0  ;;  %v3260_v15 = vsel %vm3196_vm12, %v3810_v51, %v3228_v57 }
 0x2e7   :  { %v3811_v29 = vadd.f32 %v3136_v27, %v5732_v31  ;;  %v3138_v59 = vpop.f32.mrb[45].mxu0  ;;  %v3679_v38 = vpack.c.bf16 %v3260_v15, %v3258_v60 }
 0x2e8   :  { %v3812_v21 = vadd.f32 %v3138_v59, %v5735_v16  ;;  %v3140_v61 = vpop.f32.mrb[46].mxu0 }
 0x2e9   :  { %v3229_v62 = vmul.f32 0.2, %v3811_v29  ;;  %v3813_v40 = vadd.f32 %v3140_v61, %v5732_v31  ;;  %v3142_v33 = vpop.f32.mrb[47].mxu0  ;;  %3680 = vmatprep.subr.bf16.mxu1 %v3679_v38  ;;  %vm3197_vm13 = vcmp.gt.f32.partialorder %v3811_v29, 0.0 }
 0x2ea   :  { %v3230_v63 = vmul.f32 0.2, %v3812_v21  ;;  %v3814_v18 = vadd.f32 %v3142_v33, %v5735_v16  ;;  %3682 = vmatpush1.bf16.xpose.msra.mxu1 %v3681_v58  ;;  %vm3198_vm14 = vcmp.gt.f32.partialorder %v3812_v21, 0.0 }
 0x2eb   :  { %vm3199_vm15 = vcmp.gt.f32.partialorder %v3813_v40, 0.0  ;;  %v3231_v0 = vmul.f32 0.2, %v3813_v40  ;;  %v3261_v41 = vsel %vm3197_vm13, %v3811_v29, %v3229_v62 }
 0x2ec   :  { %vm3200_vm0 = vcmp.gt.f32.partialorder %v3814_v18, 0.0  ;;  %v3232_v3 = vmul.f32 0.2, %v3814_v18  ;;  %v3262_v10 = vsel %vm3198_vm14, %v3812_v21, %v3230_v63 }
 0x2ed   :  { %v3263_v4 = vsel %vm3199_vm15, %v3813_v40, %v3231_v0 }
 0x2ee   :  { %v3685_v5 = vpack.c.bf16 %v3263_v4, %v3261_v41  ;;  %v3146_v45 = vpop.f32.mrb[48].mxu0  ;;  %v3264_v48 = vsel %vm3200_vm0, %v3814_v18, %v3232_v3 }
 0x2ef   :  { %v3815_v22 = vadd.f32 %v3146_v45, %v5732_v31  ;;  %v3148_v6 = vpop.f32.mrb[49].mxu0  ;;  %v3683_v11 = vpack.c.bf16 %v3264_v48, %v3262_v10 }
 0x2f0   :  { %v3816_v13 = vadd.f32 %v3148_v6, %v5735_v16  ;;  %v3150_v7 = vpop.f32.mrb[50].mxu0 }
 0x2f1   :  { %v3233_v34 = vmul.f32 0.2, %v3815_v22  ;;  %v3817_v1 = vadd.f32 %v3150_v7, %v5732_v31  ;;  %v3152_v37 = vpop.f32.mrb[51].mxu0  ;;  %3684 = vmatprep.subr.bf16.mxu1 %v3683_v11  ;;  %vm3201_vm1 = vcmp.gt.f32.partialorder %v3815_v22, 0.0 }
 0x2f2   :  { %v3234_v35 = vmul.f32 0.2, %v3816_v13  ;;  %v3818_v17 = vadd.f32 %v3152_v37, %v5735_v16  ;;  %3686 = vmatpush1.bf16.xpose.msra.mxu1 %v3685_v5  ;;  %vm3202_vm2 = vcmp.gt.f32.partialorder %v3816_v13, 0.0 }
 0x2f3   :  { %vm3203_vm3 = vcmp.gt.f32.partialorder %v3817_v1, 0.0  ;;  %v3235_v24 = vmul.f32 0.2, %v3817_v1  ;;  %v3265_v39 = vsel %vm3201_vm1, %v3815_v22, %v3233_v34 }
 0x2f4   :  { %vm3204_vm4 = vcmp.gt.f32.partialorder %v3818_v17, 0.0  ;;  %v3236_v19 = vmul.f32 0.2, %v3818_v17  ;;  %v3266_v43 = vsel %vm3202_vm2, %v3816_v13, %v3234_v35 }
 0x2f5   :  { %v3267_v20 = vsel %vm3203_vm3, %v3817_v1, %v3235_v24 }
 0x2f6   :  { %v3689_v36 = vpack.c.bf16 %v3267_v20, %v3265_v39  ;;  %v3156_v8 = vpop.f32.mrb[52].mxu0  ;;  %v3268_v42 = vsel %vm3204_vm4, %v3818_v17, %v3236_v19  ;;  %v3286_v39 = vpop.permute.xlu0 %3285 }
 0x2f7   :  { %v3819_v25 = vadd.f32 %v3156_v8, %v5732_v31  ;;  %v3158_v12 = vpop.f32.mrb[53].mxu0  ;;  %v3687_v23 = vpack.c.bf16 %v3268_v42, %v3266_v43 }
 0x2f8   :  { %v3820_v44 = vadd.f32 %v3158_v12, %v5735_v16  ;;  %v3160_v46 = vpop.f32.mrb[54].mxu0 }
 0x2f9   :  { %v3237_v26 = vmul.f32 0.2, %v3819_v25  ;;  %v3821_v28 = vadd.f32 %v3160_v46, %v5732_v31  ;;  %v3162_v47 = vpop.f32.mrb[55].mxu0  ;;  %3688 = vmatprep.subr.bf16.mxu1 %v3687_v23  ;;  %vm3205_vm5 = vcmp.gt.f32.partialorder %v3819_v25, 0.0 }
 0x2fa   :  { %v3238_v2 = vmul.f32 0.2, %v3820_v44  ;;  %v3822_v53 = vadd.f32 %v3162_v47, %v5735_v16  ;;  %3690 = vmatpush1.bf16.xpose.msra.mxu1 %v3689_v36  ;;  %vm3206_vm6 = vcmp.gt.f32.partialorder %v3820_v44, 0.0 }
 0x2fb   :  { %vm3207_vm7 = vcmp.gt.f32.partialorder %v3821_v28, 0.0  ;;  %v3239_v32 = vmul.f32 0.2, %v3821_v28  ;;  %v3269_v56 = vsel %vm3205_vm5, %v3819_v25, %v3237_v26 }
 0x2fc   :  { %vm3208_vm8 = vcmp.gt.f32.partialorder %v3822_v53, 0.0  ;;  %v3240_v30 = vmul.f32 0.2, %v3822_v53  ;;  %v3270_v52 = vsel %vm3206_vm6, %v3820_v44, %v3238_v2 }
 0x2fd   :  { %v3271_v49 = vsel %vm3207_vm7, %v3821_v28, %v3239_v32 }
 0x2fe   :  { %v3693_v50 = vpack.c.bf16 %v3271_v49, %v3269_v56  ;;  %v3166_v51 = vpop.f32.mrb[56].mxu0  ;;  %v3272_v57 = vsel %vm3208_vm8, %v3822_v53, %v3240_v30 }
 0x2ff   :  { %v3823_v55 = vadd.f32 %v3166_v51, %v5732_v31  ;;  %v3168_v14 = vpop.f32.mrb[57].mxu0  ;;  %v3691_v58 = vpack.c.bf16 %v3272_v57, %v3270_v52 }
 0x300   :  { %v3824_v27 = vadd.f32 %v3168_v14, %v5735_v16  ;;  %v3170_v60 = vpop.f32.mrb[58].mxu0 }
 0x301   :  { %v3241_v15 = vmul.f32 0.2, %v3823_v55  ;;  %v3825_v29 = vadd.f32 %v3170_v60, %v5732_v31  ;;  %v3172_v59 = vpop.f32.mrb[59].mxu0  ;;  %3692 = vmatprep.subr.bf16.mxu1 %v3691_v58  ;;  %vm3209_vm9 = vcmp.gt.f32.partialorder %v3823_v55, 0.0 }
 0x302   :  { %v3242_v38 = vmul.f32 0.2, %v3824_v27  ;;  %v3826_v21 = vadd.f32 %v3172_v59, %v5735_v16  ;;  %3694 = vmatpush1.bf16.xpose.msra.mxu1 %v3693_v50  ;;  %vm3210_vm10 = vcmp.gt.f32.partialorder %v3824_v27, 0.0 }
 0x303   :  { %vm3211_vm11 = vcmp.gt.f32.partialorder %v3825_v29, 0.0  ;;  %v3243_v61 = vmul.f32 0.2, %v3825_v29  ;;  %v3273_v40 = vsel %vm3209_vm9, %v3823_v55, %v3241_v15 }
 0x304   :  { %vm3212_vm12 = vcmp.gt.f32.partialorder %v3826_v21, 0.0  ;;  %v3244_v62 = vmul.f32 0.2, %v3826_v21  ;;  %v3274_v0 = vsel %vm3210_vm10, %v3824_v27, %v3242_v38 }
 0x305   :  { %v3275_v33 = vsel %vm3211_vm11, %v3825_v29, %v3243_v61 }
 0x306   :  { %v3697_v63 = vpack.c.bf16 %v3275_v33, %v3273_v40  ;;  %v3176_v18 = vpop.f32.mrb[60].mxu0  ;;  %v3276_v3 = vsel %vm3212_vm12, %v3826_v21, %v3244_v62 }
 0x307   :  { %v3827_v41 = vadd.f32 %v3176_v18, %v5732_v31  ;;  %v3178_v4 = vpop.f32.mrb[61].mxu0  ;;  %v3695_v5 = vpack.c.bf16 %v3276_v3, %v3274_v0 }
 0x308   :  { %v3828_v45 = vadd.f32 %v3178_v4, %v5735_v16  ;;  %v3180_v10 = vpop.f32.mrb[62].mxu0 }
 0x309   :  { %v3245_v48 = vmul.f32 0.2, %v3827_v41  ;;  %v3829_v22 = vadd.f32 %v3180_v10, %v5732_v31  ;;  %v3182_v6 = vpop.f32.mrb[63].mxu0  ;;  %3696 = vmatprep.subr.bf16.mxu1 %v3695_v5  ;;  %vm3213_vm13 = vcmp.gt.f32.partialorder %v3827_v41, 0.0  ;;  %v3296_v31 = vrot.slane %v5724_v9, %v5587_v54 }
 0x30a   :  { %v3246_v11 = vmul.f32 0.2, %v3828_v45  ;;  %v3830_v13 = vadd.f32 %v3182_v6, %v5735_v16  ;;  %3698 = vmatpush1.bf16.xpose.msra.mxu1 %v3697_v63  ;;  %vm3214_vm14 = vcmp.gt.f32.partialorder %v3828_v45, 0.0  ;;  %v3291_v16 = vrot.slane %v3286_v39, %v5587_v54 }
 0x30b   :  { %vm3215_vm15 = vcmp.gt.f32.partialorder %v3829_v22, 0.0  ;;  %v3247_v7 = vmul.f32 0.2, %v3829_v22  ;;  %v3277_v1 = vsel %vm3213_vm13, %v3827_v41, %v3245_v48 }
 0x30c   :  { %vm3216_vm0 = vcmp.gt.f32.partialorder %v3830_v13, 0.0  ;;  %v3248_v34 = vmul.f32 0.2, %v3830_v13  ;;  %v3278_v17 = vsel %vm3214_vm14, %v3828_v45, %v3246_v11 }
 0x30d   :  { %v3279_v37 = vsel %vm3215_vm15, %v3829_v22, %v3247_v7 }
 0x30e   :  { %v3701_v35 = vpack.c.bf16 %v3279_v37, %v3277_v1  ;;  %v3280_v24 = vsel %vm3216_vm0, %v3830_v13, %v3248_v34 }
 0x30f   :  { %v3699_v19 = vpack.c.bf16 %v3280_v24, %v3278_v17 }
 0x311   :  { %3700 = vmatprep.subr.bf16.mxu1 %v3699_v19 }
 0x312   :  { %3702 = vmatpush1.bf16.xpose.msra.mxu1 %v3701_v35 }
 0x319   :  { %3368 = vmatmul.mubr.f32.vlgmr.msra.gmra.mrb[64].mxu1 %v3296_v31 }
 0x3ec   :  { %v3369_v20 = vpop.f32.mrb[64].mxu1 }
 0x3ed   :  { %v3370_v36 = vadd.f32 %v3369_v20, %v3291_v16  ;;  %v3371_v8 = vpop.f32.mrb[65].mxu1 }
 0x3ef   :  { %v3373_v43 = vsub.f32 0.0, %v3370_v36 }
 0x3f1   :  { %v3374_v42 = vmul.f32 1.442695, %v3373_v43 }
 0x3f3   :  { %4419 = vpow2.f32 %v3374_v42 }
 0x3fd   :  { %v4420_v25 = vpop.eup %4419 }
 0x3fe   :  { %v3376_v12 = vadd.f32 1.0, %v4420_v25 }
 0x400   :  { %4421 = vrcp.f32 %v3376_v12 }
 0x40a   :  { %v4422_v23 = vpop.eup %4421 }
 0x40b   :  { %3379 = vst [vmem:[#allocation6] sm:$0x1] %v4422_v23 }
 0x40c   :  { %4456 = shalt.err (!%p4453_p12)
}
 0x40d   :  { %s4457_s1 = scalar_lea.hbm %s5791_s7, 16 }
 0x40e   :  { %p4458_p13 = scmp.ne.s32.totalorder %s5791_s7, %s4457_s1  ;;  %p4461_p0 = scmp.lt.u32.totalorder %s4457_s1, %s5791_s7 }
 0x410   :  { %p4463_p1 = pnand %p4461_p0, %p4458_p13 }
 0x412   :  { %4466 = shalt.err (!%p4463_p1)
}
 0x413   :  { %3389 = dma.vmem_to_hbm [thread:$0]  %s3387_s5, 16, %s5791_s7, [#allocation5]  }
 0x414   :  { %4469 = dma.done.wait [#allocation5], 16  }
 0x415   :  { %4470 = vsyncadd [#allocation5], 4294967280 }
 0x416   :  { %3393 = vsyncpa [#allocation4], 1 }
 0x417   :  { %3394 = vsyncpa [#allocation5], 1 }

</bundles_post_ra>
